<compile_context>
chip_gen: v7x
topology: tpu7x:2x2x1
jax: 0.10.0
libtpu: 0.0.40
codegen_flags: <defaults>
</compile_context>

<pallas_src>
import functools

import jax
import jax.numpy as jnp
from jax.experimental import pallas as pl
from jax.experimental.pallas import tpu as pltpu


# -----------------------------------------------------------------------------
# Fused kernel: one batch element per grid step; everything stays in VMEM/vregs.
#   conv1 (3x3, C->hidden) + bias + time-emb + SiLU  ->  h (stays in registers)
#   conv2 (3x3, hidden->C) + bias, emitted as (C, HW): lane-dense, NCHW-flat.
# Each conv = 9 taps of { lane-roll (XLU) , boundary mask (VPU) , matmul (MXU) }.
# -----------------------------------------------------------------------------
def _fused_rf_kernel(x_ref, mask_ref, w1_ref, bias1_ref, w2_ref, b2_ref,
                     out_ref, *, H, W, C, hidden):
    HW = H * W
    f32, bf16 = jnp.float32, jnp.bfloat16

    # (tap, lane-shift) pairs: output position p needs input p + dy*W + dx,
    # i.e. roll by (-(dy*W+dx)) mod HW, then zero the wrapped (out-of-image)
    # positions with the per-tap mask.
    taps = []
    for ky in range(3):
        for kx in range(3):
            off = (ky - 1) * W + (kx - 1)
            taps.append((ky * 3 + kx, (-off) % HW))

    masks = [mask_ref[t] for t in range(9)]            # each (1, HW) f32

    # ---------------- conv1 (C -> hidden) + bias + time emb + SiLU ----------
    x = x_ref[0]                                       # (C, HW) f32
    acc1 = jnp.zeros((hidden, HW), f32)
    for t, shift in taps:
        if shift == 0:
            xt = x                                     # center tap: mask == 1
        else:
            xt = pltpu.roll(x, shift, 1) * masks[t]    # XLU roll + VPU mask
        acc1 = acc1 + jnp.dot(w1_ref[t], xt.astype(bf16),
                              preferred_element_type=f32)

    h = acc1 + bias1_ref[0]                            # conv1 bias + time emb
    h = h * jax.nn.sigmoid(h)                          # SiLU (EUP)

    # ---------------- conv2 (hidden -> C) ------------------------------------
    acc2 = jnp.zeros((C, HW), f32)
    for t, shift in taps:
        if shift == 0:
            ht = h
        else:
            ht = pltpu.roll(h, shift, 1) * masks[t]
        acc2 = acc2 + jnp.dot(w2_ref[t], ht.astype(bf16),
                              preferred_element_type=f32)

    out_ref[0] = acc2 + b2_ref[...]                    # (C, HW), lane-dense


def rectified_flow_forward(x_nchw, t_in, params):
    """Matches RectifiedFlow.forward(x, t_in) with the synthetic `model` above.

    x_nchw : (B, C, H, W) float32
    t_in   : (B, 1)       float32
    returns: (B, C, H, W) float32
    """
    B, C, H, W = x_nchw.shape
    hidden = params["w1"].shape[1]
    HW = H * W
    f32, bf16 = jnp.float32, jnp.bfloat16

    # --- time embedding, hoisted out of the kernel grid ----------------------
    # te = t_in.expand(B, E)  =>  te @ Wt == t_in * Wt.sum(0)   (exact identity)
    temb = t_in.astype(f32) * jnp.sum(params["wt"], axis=0)[None, :] + params["bt"]
    temb = temb * jax.nn.sigmoid(temb)                       # SiLU, (B, hidden)
    bias1 = (temb + params["b1"]).reshape(B, hidden, 1).astype(f32)

    # --- NCHW-flat activations: free reshape, 256-lane-dense last dim --------
    x = x_nchw.reshape(B, C, HW).astype(f32)                 # (B, C, HW)

    # --- per-tap weights, (out_ch, in_ch) orientation, bf16 for the MXU ------
    w1t = jnp.transpose(params["w1"].reshape(9, C, hidden),
                        (0, 2, 1)).astype(bf16)              # (9, hidden, C)
    w2t = jnp.transpose(params["w2"].reshape(9, hidden, C),
                        (0, 2, 1)).astype(bf16)              # (9, C, hidden)
    b2 = params["b2"].reshape(C, 1).astype(f32)              # (C, 1)

    # --- per-tap zero-padding masks over the flattened H*W axis --------------
    r = jnp.arange(H, dtype=jnp.int32)[:, None]
    c = jnp.arange(W, dtype=jnp.int32)[None, :]
    m = []
    for ky in range(3):
        for kx in range(3):
            dy, dx = ky - 1, kx - 1
            valid = ((r + dy >= 0) & (r + dy < H) &
                     (c + dx >= 0) & (c + dx < W))
            m.append(valid.reshape(1, HW))
    masks = jnp.stack(m, axis=0).astype(f32)                 # (9, 1, HW)

    kernel = functools.partial(_fused_rf_kernel, H=H, W=W, C=C, hidden=hidden)

    out_flat = pl.pallas_call(
        kernel,
        out_shape=jax.ShapeDtypeStruct((B, C, HW), f32),
        grid_spec=pltpu.PrefetchScalarGridSpec(
            num_scalar_prefetch=0,
            grid=(B,),
            in_specs=[
                pl.BlockSpec((1, C, HW), lambda b: (b, 0, 0)),        # x[b]
                pl.BlockSpec((9, 1, HW), lambda b: (0, 0, 0)),        # tap masks
                pl.BlockSpec((9, hidden, C), lambda b: (0, 0, 0)),    # W1 taps
                pl.BlockSpec((1, hidden, 1), lambda b: (b, 0, 0)),    # b1 + temb[b]
                pl.BlockSpec((9, C, hidden), lambda b: (0, 0, 0)),    # W2 taps
                pl.BlockSpec((C, 1), lambda b: (0, 0)),               # b2
            ],
            out_specs=pl.BlockSpec((1, C, HW), lambda b: (b, 0, 0)),  # lane-dense
        ),
        compiler_params=pltpu.CompilerParams(
            dimension_semantics=("parallel",)),
    )(x, masks, w1t, bias1, w2t, b2)

    # (B, C, H*W) is already NCHW-flat; this reshape is free.
    return out_flat.reshape(B, C, H, W)


# -----------------------------------------------------------------------------
# Pure-JAX reference (same synthetic model), for a correctness cross-check.
# -----------------------------------------------------------------------------
def reference_forward(x_nchw, t_in, params):
    B, C, H, W = x_nchw.shape
    hidden = params["w1"].shape[1]
    E = params["wt"].shape[0]
    HW = H * W

    te = jnp.broadcast_to(t_in.astype(jnp.float32), (B, E))
    temb = te @ params["wt"] + params["bt"]
    temb = temb * jax.nn.sigmoid(temb)

    def im2col(a):  # (B, Ch, H, W) -> (B, 9*Ch, HW), zero-padded 3x3 patches
        ap = jnp.pad(a, ((0, 0), (0, 0), (1, 1), (1, 1)))
        cols = [ap[:, :, ky:ky + H, kx:kx + W]
                for ky in range(3) for kx in range(3)]
        return jnp.stack(cols, axis=1).reshape(B, -1, HW)

    h = (jnp.einsum("bkp,kh->bhp", im2col(x_nchw), params["w1"])
         + params["b1"].reshape(1, hidden, 1) + temb[:, :, None])
    h = h * jax.nn.sigmoid(h)
    out = (jnp.einsum("bkp,kc->bcp", im2col(h.reshape(B, hidden, H, W)),
                      params["w2"])
           + params["b2"].reshape(1, C, 1))
    return out.reshape(B, C, H, W)


def init_params(key, C, hidden, embedding_size):
    """Deterministic synthetic parameter init (no checkpoint loading)."""
    k1, k2, k3 = jax.random.split(key, 3)
    scale1 = 1.0 / jnp.sqrt(9.0 * C)
    scale2 = 1.0 / jnp.sqrt(9.0 * hidden)
    scalet = 1.0 / jnp.sqrt(float(embedding_size))
    return {
        "w1": jax.random.normal(k1, (9 * C, hidden), jnp.float32) * scale1,
        "b1": jnp.zeros((1, hidden), jnp.float32),
        "w2": jax.random.normal(k2, (9 * hidden, C), jnp.float32) * scale2,
        "b2": jnp.zeros((1, C), jnp.float32),
        "wt": jax.random.normal(k3, (embedding_size, hidden), jnp.float32) * scalet,
        "bt": jnp.zeros((1, hidden), jnp.float32),
    }


if __name__ == "__main__":
    # Small shapes consistent with the module: batch=2, channels=4, spatial=16.
    B, C, H, W = 2, 4, 16, 16
    hidden = 32
    embedding_size = 2  # RectifiedFlow default

    key = jax.random.PRNGKey(0)
    kx, kt, kp = jax.random.split(key, 3)

    x = jax.random.normal(kx, (B, C, H, W), jnp.float32)      # NCHW like PyTorch
    t_in = jax.random.uniform(kt, (B, 1), jnp.float32)        # ti in [0, 1)

    params = init_params(kp, C, hidden, embedding_size)

    out = rectified_flow_forward(x, t_in, params)
    out = jax.block_until_ready(out)

    assert out.shape == (B, C, H, W), out.shape
    assert out.dtype == jnp.float32
    assert bool(jnp.all(jnp.isfinite(out)))

    # Correctness vs. pure-JAX reference (bf16 MXU operands -> loose tolerance).
    ref = reference_forward(x, t_in, params)
    max_err = float(jnp.max(jnp.abs(out - ref)))
    assert max_err < 1e-1, f"max |err| = {max_err}"

    print("KERNEL_OK")
</pallas_src>

<mosaic_0001>
module attributes {stable_mosaic.version = 11 : i64} {
  func.func @_fused_rf_kernel(%arg0: i32, %arg1: memref<1x4x256xf32, #tpu.memory_space<vmem>>, %arg2: memref<9x1x256xf32, #tpu.memory_space<vmem>>, %arg3: memref<9x32x4xbf16, #tpu.memory_space<vmem>>, %arg4: memref<1x32x1xf32, #tpu.memory_space<vmem>>, %arg5: memref<9x4x32xbf16, #tpu.memory_space<vmem>>, %arg6: memref<4x1xf32, #tpu.memory_space<vmem>>, %arg7: memref<1x4x256xf32, #tpu.memory_space<vmem>>) attributes {dimension_semantics = [#tpu.dimension_semantics<parallel>], iteration_bounds = array<i64: 2>, scalar_prefetch = 0 : i64, scratch_operands = 0 : i64, tpu.core_type = #tpu.core_type<tc>, window_params = [{transform_indices = @transform_0, window_bounds = array<i64: 1, 4, 256>}, {pipeline_mode = #tpu.pipeline_mode<synchronous>, transform_indices = @transform_1, window_bounds = array<i64: 9, 1, 256>}, {pipeline_mode = #tpu.pipeline_mode<synchronous>, transform_indices = @transform_2, window_bounds = array<i64: 9, 32, 4>}, {transform_indices = @transform_3, window_bounds = array<i64: 1, 32, 1>}, {pipeline_mode = #tpu.pipeline_mode<synchronous>, transform_indices = @transform_4, window_bounds = array<i64: 9, 4, 32>}, {pipeline_mode = #tpu.pipeline_mode<synchronous>, transform_indices = @transform_5, window_bounds = array<i64: 4, 1>}, {transform_indices = @transform_6, window_bounds = array<i64: 1, 4, 256>}]} {
    %c0 = arith.constant 0 : index
    %c0_0 = arith.constant 0 : index
    %c0_1 = arith.constant 0 : index
    %0 = vector.load %arg2[%c0, %c0_0, %c0_1] : memref<9x1x256xf32, #tpu.memory_space<vmem>>, vector<1x1x256xf32>
    %1 = vector.shape_cast %0 : vector<1x1x256xf32> to vector<1x256xf32>
    %c1 = arith.constant 1 : index
    %c0_2 = arith.constant 0 : index
    %c0_3 = arith.constant 0 : index
    %2 = vector.load %arg2[%c1, %c0_2, %c0_3] : memref<9x1x256xf32, #tpu.memory_space<vmem>>, vector<1x1x256xf32>
    %3 = vector.shape_cast %2 : vector<1x1x256xf32> to vector<1x256xf32>
    %c2 = arith.constant 2 : index
    %c0_4 = arith.constant 0 : index
    %c0_5 = arith.constant 0 : index
    %4 = vector.load %arg2[%c2, %c0_4, %c0_5] : memref<9x1x256xf32, #tpu.memory_space<vmem>>, vector<1x1x256xf32>
    %5 = vector.shape_cast %4 : vector<1x1x256xf32> to vector<1x256xf32>
    %c3 = arith.constant 3 : index
    %c0_6 = arith.constant 0 : index
    %c0_7 = arith.constant 0 : index
    %6 = vector.load %arg2[%c3, %c0_6, %c0_7] : memref<9x1x256xf32, #tpu.memory_space<vmem>>, vector<1x1x256xf32>
    %7 = vector.shape_cast %6 : vector<1x1x256xf32> to vector<1x256xf32>
    %c5 = arith.constant 5 : index
    %c0_8 = arith.constant 0 : index
    %c0_9 = arith.constant 0 : index
    %8 = vector.load %arg2[%c5, %c0_8, %c0_9] : memref<9x1x256xf32, #tpu.memory_space<vmem>>, vector<1x1x256xf32>
    %9 = vector.shape_cast %8 : vector<1x1x256xf32> to vector<1x256xf32>
    %c6 = arith.constant 6 : index
    %c0_10 = arith.constant 0 : index
    %c0_11 = arith.constant 0 : index
    %10 = vector.load %arg2[%c6, %c0_10, %c0_11] : memref<9x1x256xf32, #tpu.memory_space<vmem>>, vector<1x1x256xf32>
    %11 = vector.shape_cast %10 : vector<1x1x256xf32> to vector<1x256xf32>
    %c7 = arith.constant 7 : index
    %c0_12 = arith.constant 0 : index
    %c0_13 = arith.constant 0 : index
    %12 = vector.load %arg2[%c7, %c0_12, %c0_13] : memref<9x1x256xf32, #tpu.memory_space<vmem>>, vector<1x1x256xf32>
    %13 = vector.shape_cast %12 : vector<1x1x256xf32> to vector<1x256xf32>
    %c8 = arith.constant 8 : index
    %c0_14 = arith.constant 0 : index
    %c0_15 = arith.constant 0 : index
    %14 = vector.load %arg2[%c8, %c0_14, %c0_15] : memref<9x1x256xf32, #tpu.memory_space<vmem>>, vector<1x1x256xf32>
    %15 = vector.shape_cast %14 : vector<1x1x256xf32> to vector<1x256xf32>
    %c0_16 = arith.constant 0 : index
    %c0_17 = arith.constant 0 : index
    %c0_18 = arith.constant 0 : index
    %16 = vector.load %arg1[%c0_16, %c0_17, %c0_18] : memref<1x4x256xf32, #tpu.memory_space<vmem>>, vector<1x4x256xf32>
    %17 = vector.shape_cast %16 : vector<1x4x256xf32> to vector<4x256xf32>
    %cst = arith.constant 0.000000e+00 : f32
    %18 = vector.broadcast %cst : f32 to vector<32x256xf32>
    %c17_i32 = arith.constant 17 : i32
    %19 = tpu.dynamic_rotate %17 by %c17_i32 dim 1 : vector<4x256xf32>, i32 -> vector<4x256xf32>
    %20 = vector.broadcast %1 : vector<1x256xf32> to vector<4x256xf32>
    %21 = arith.mulf %19, %20 : vector<4x256xf32>
    %c0_19 = arith.constant 0 : index
    %c0_20 = arith.constant 0 : index
    %c0_21 = arith.constant 0 : index
    %22 = vector.load %arg3[%c0_19, %c0_20, %c0_21] : memref<9x32x4xbf16, #tpu.memory_space<vmem>>, vector<1x32x4xbf16>
    %23 = vector.shape_cast %22 : vector<1x32x4xbf16> to vector<32x4xbf16>
    %24 = arith.truncf %21 : vector<4x256xf32> to vector<4x256xbf16>
    %cst_22 = arith.constant dense<0.000000e+00> : vector<32x256xf32>
    %25 = tpu.matmul %23, %24, %cst_22 {dimension_numbers = #tpu.dot_dimension_numbers<[1], [0], [0], [1], [0, 0, 1, 1], [], []>} : vector<32x4xbf16>, vector<4x256xbf16>, vector<32x256xf32> -> vector<32x256xf32>
    %26 = arith.addf %18, %25 : vector<32x256xf32>
    %c16_i32 = arith.constant 16 : i32
    %27 = tpu.dynamic_rotate %17 by %c16_i32 dim 1 : vector<4x256xf32>, i32 -> vector<4x256xf32>
    %28 = vector.broadcast %3 : vector<1x256xf32> to vector<4x256xf32>
    %29 = arith.mulf %27, %28 : vector<4x256xf32>
    %c1_23 = arith.constant 1 : index
    %c0_24 = arith.constant 0 : index
    %c0_25 = arith.constant 0 : index
    %30 = vector.load %arg3[%c1_23, %c0_24, %c0_25] : memref<9x32x4xbf16, #tpu.memory_space<vmem>>, vector<1x32x4xbf16>
    %31 = vector.shape_cast %30 : vector<1x32x4xbf16> to vector<32x4xbf16>
    %32 = arith.truncf %29 : vector<4x256xf32> to vector<4x256xbf16>
    %cst_26 = arith.constant dense<0.000000e+00> : vector<32x256xf32>
    %33 = tpu.matmul %31, %32, %cst_26 {dimension_numbers = #tpu.dot_dimension_numbers<[1], [0], [0], [1], [0, 0, 1, 1], [], []>} : vector<32x4xbf16>, vector<4x256xbf16>, vector<32x256xf32> -> vector<32x256xf32>
    %34 = arith.addf %26, %33 : vector<32x256xf32>
    %c15_i32 = arith.constant 15 : i32
    %35 = tpu.dynamic_rotate %17 by %c15_i32 dim 1 : vector<4x256xf32>, i32 -> vector<4x256xf32>
    %36 = vector.broadcast %5 : vector<1x256xf32> to vector<4x256xf32>
    %37 = arith.mulf %35, %36 : vector<4x256xf32>
    %c2_27 = arith.constant 2 : index
    %c0_28 = arith.constant 0 : index
    %c0_29 = arith.constant 0 : index
    %38 = vector.load %arg3[%c2_27, %c0_28, %c0_29] : memref<9x32x4xbf16, #tpu.memory_space<vmem>>, vector<1x32x4xbf16>
    %39 = vector.shape_cast %38 : vector<1x32x4xbf16> to vector<32x4xbf16>
    %40 = arith.truncf %37 : vector<4x256xf32> to vector<4x256xbf16>
    %cst_30 = arith.constant dense<0.000000e+00> : vector<32x256xf32>
    %41 = tpu.matmul %39, %40, %cst_30 {dimension_numbers = #tpu.dot_dimension_numbers<[1], [0], [0], [1], [0, 0, 1, 1], [], []>} : vector<32x4xbf16>, vector<4x256xbf16>, vector<32x256xf32> -> vector<32x256xf32>
    %42 = arith.addf %34, %41 : vector<32x256xf32>
    %c1_i32 = arith.constant 1 : i32
    %43 = tpu.dynamic_rotate %17 by %c1_i32 dim 1 : vector<4x256xf32>, i32 -> vector<4x256xf32>
    %44 = vector.broadcast %7 : vector<1x256xf32> to vector<4x256xf32>
    %45 = arith.mulf %43, %44 : vector<4x256xf32>
    %c3_31 = arith.constant 3 : index
    %c0_32 = arith.constant 0 : index
    %c0_33 = arith.constant 0 : index
    %46 = vector.load %arg3[%c3_31, %c0_32, %c0_33] : memref<9x32x4xbf16, #tpu.memory_space<vmem>>, vector<1x32x4xbf16>
    %47 = vector.shape_cast %46 : vector<1x32x4xbf16> to vector<32x4xbf16>
    %48 = arith.truncf %45 : vector<4x256xf32> to vector<4x256xbf16>
    %cst_34 = arith.constant dense<0.000000e+00> : vector<32x256xf32>
    %49 = tpu.matmul %47, %48, %cst_34 {dimension_numbers = #tpu.dot_dimension_numbers<[1], [0], [0], [1], [0, 0, 1, 1], [], []>} : vector<32x4xbf16>, vector<4x256xbf16>, vector<32x256xf32> -> vector<32x256xf32>
    %50 = arith.addf %42, %49 : vector<32x256xf32>
    %c4 = arith.constant 4 : index
    %c0_35 = arith.constant 0 : index
    %c0_36 = arith.constant 0 : index
    %51 = vector.load %arg3[%c4, %c0_35, %c0_36] : memref<9x32x4xbf16, #tpu.memory_space<vmem>>, vector<1x32x4xbf16>
    %52 = vector.shape_cast %51 : vector<1x32x4xbf16> to vector<32x4xbf16>
    %53 = arith.truncf %17 : vector<4x256xf32> to vector<4x256xbf16>
    %cst_37 = arith.constant dense<0.000000e+00> : vector<32x256xf32>
    %54 = tpu.matmul %52, %53, %cst_37 {dimension_numbers = #tpu.dot_dimension_numbers<[1], [0], [0], [1], [0, 0, 1, 1], [], []>} : vector<32x4xbf16>, vector<4x256xbf16>, vector<32x256xf32> -> vector<32x256xf32>
    %55 = arith.addf %50, %54 : vector<32x256xf32>
    %c255_i32 = arith.constant 255 : i32
    %56 = tpu.dynamic_rotate %17 by %c255_i32 dim 1 : vector<4x256xf32>, i32 -> vector<4x256xf32>
    %57 = vector.broadcast %9 : vector<1x256xf32> to vector<4x256xf32>
    %58 = arith.mulf %56, %57 : vector<4x256xf32>
    %c5_38 = arith.constant 5 : index
    %c0_39 = arith.constant 0 : index
    %c0_40 = arith.constant 0 : index
    %59 = vector.load %arg3[%c5_38, %c0_39, %c0_40] : memref<9x32x4xbf16, #tpu.memory_space<vmem>>, vector<1x32x4xbf16>
    %60 = vector.shape_cast %59 : vector<1x32x4xbf16> to vector<32x4xbf16>
    %61 = arith.truncf %58 : vector<4x256xf32> to vector<4x256xbf16>
    %cst_41 = arith.constant dense<0.000000e+00> : vector<32x256xf32>
    %62 = tpu.matmul %60, %61, %cst_41 {dimension_numbers = #tpu.dot_dimension_numbers<[1], [0], [0], [1], [0, 0, 1, 1], [], []>} : vector<32x4xbf16>, vector<4x256xbf16>, vector<32x256xf32> -> vector<32x256xf32>
    %63 = arith.addf %55, %62 : vector<32x256xf32>
    %c241_i32 = arith.constant 241 : i32
    %64 = tpu.dynamic_rotate %17 by %c241_i32 dim 1 : vector<4x256xf32>, i32 -> vector<4x256xf32>
    %65 = vector.broadcast %11 : vector<1x256xf32> to vector<4x256xf32>
    %66 = arith.mulf %64, %65 : vector<4x256xf32>
    %c6_42 = arith.constant 6 : index
    %c0_43 = arith.constant 0 : index
    %c0_44 = arith.constant 0 : index
    %67 = vector.load %arg3[%c6_42, %c0_43, %c0_44] : memref<9x32x4xbf16, #tpu.memory_space<vmem>>, vector<1x32x4xbf16>
    %68 = vector.shape_cast %67 : vector<1x32x4xbf16> to vector<32x4xbf16>
    %69 = arith.truncf %66 : vector<4x256xf32> to vector<4x256xbf16>
    %cst_45 = arith.constant dense<0.000000e+00> : vector<32x256xf32>
    %70 = tpu.matmul %68, %69, %cst_45 {dimension_numbers = #tpu.dot_dimension_numbers<[1], [0], [0], [1], [0, 0, 1, 1], [], []>} : vector<32x4xbf16>, vector<4x256xbf16>, vector<32x256xf32> -> vector<32x256xf32>
    %71 = arith.addf %63, %70 : vector<32x256xf32>
    %c240_i32 = arith.constant 240 : i32
    %72 = tpu.dynamic_rotate %17 by %c240_i32 dim 1 : vector<4x256xf32>, i32 -> vector<4x256xf32>
    %73 = vector.broadcast %13 : vector<1x256xf32> to vector<4x256xf32>
    %74 = arith.mulf %72, %73 : vector<4x256xf32>
    %c7_46 = arith.constant 7 : index
    %c0_47 = arith.constant 0 : index
    %c0_48 = arith.constant 0 : index
    %75 = vector.load %arg3[%c7_46, %c0_47, %c0_48] : memref<9x32x4xbf16, #tpu.memory_space<vmem>>, vector<1x32x4xbf16>
    %76 = vector.shape_cast %75 : vector<1x32x4xbf16> to vector<32x4xbf16>
    %77 = arith.truncf %74 : vector<4x256xf32> to vector<4x256xbf16>
    %cst_49 = arith.constant dense<0.000000e+00> : vector<32x256xf32>
    %78 = tpu.matmul %76, %77, %cst_49 {dimension_numbers = #tpu.dot_dimension_numbers<[1], [0], [0], [1], [0, 0, 1, 1], [], []>} : vector<32x4xbf16>, vector<4x256xbf16>, vector<32x256xf32> -> vector<32x256xf32>
    %79 = arith.addf %71, %78 : vector<32x256xf32>
    %c239_i32 = arith.constant 239 : i32
    %80 = tpu.dynamic_rotate %17 by %c239_i32 dim 1 : vector<4x256xf32>, i32 -> vector<4x256xf32>
    %81 = vector.broadcast %15 : vector<1x256xf32> to vector<4x256xf32>
    %82 = arith.mulf %80, %81 : vector<4x256xf32>
    %c8_50 = arith.constant 8 : index
    %c0_51 = arith.constant 0 : index
    %c0_52 = arith.constant 0 : index
    %83 = vector.load %arg3[%c8_50, %c0_51, %c0_52] : memref<9x32x4xbf16, #tpu.memory_space<vmem>>, vector<1x32x4xbf16>
    %84 = vector.shape_cast %83 : vector<1x32x4xbf16> to vector<32x4xbf16>
    %85 = arith.truncf %82 : vector<4x256xf32> to vector<4x256xbf16>
    %cst_53 = arith.constant dense<0.000000e+00> : vector<32x256xf32>
    %86 = tpu.matmul %84, %85, %cst_53 {dimension_numbers = #tpu.dot_dimension_numbers<[1], [0], [0], [1], [0, 0, 1, 1], [], []>} : vector<32x4xbf16>, vector<4x256xbf16>, vector<32x256xf32> -> vector<32x256xf32>
    %87 = arith.addf %79, %86 : vector<32x256xf32>
    %c0_54 = arith.constant 0 : index
    %c0_55 = arith.constant 0 : index
    %c0_56 = arith.constant 0 : index
    %88 = vector.load %arg4[%c0_54, %c0_55, %c0_56] : memref<1x32x1xf32, #tpu.memory_space<vmem>>, vector<1x32x1xf32>
    %89 = vector.shape_cast %88 : vector<1x32x1xf32> to vector<32x1xf32>
    %90 = vector.broadcast %89 : vector<32x1xf32> to vector<32x256xf32>
    %91 = arith.addf %87, %90 : vector<32x256xf32>
    %92 = arith.negf %91 : vector<32x256xf32>
    %93 = math.exp %92 : vector<32x256xf32>
    %cst_57 = arith.constant 1.000000e+00 : f32
    %94 = vector.broadcast %cst_57 : f32 to vector<32x256xf32>
    %95 = arith.addf %94, %93 : vector<32x256xf32>
    %96 = arith.divf %94, %95 : vector<32x256xf32>
    %97 = arith.mulf %91, %96 : vector<32x256xf32>
    %cst_58 = arith.constant 0.000000e+00 : f32
    %98 = vector.broadcast %cst_58 : f32 to vector<4x256xf32>
    %c17_i32_59 = arith.constant 17 : i32
    %99 = tpu.dynamic_rotate %97 by %c17_i32_59 dim 1 : vector<32x256xf32>, i32 -> vector<32x256xf32>
    %100 = vector.broadcast %1 : vector<1x256xf32> to vector<32x256xf32>
    %101 = arith.mulf %99, %100 : vector<32x256xf32>
    %c0_60 = arith.constant 0 : index
    %c0_61 = arith.constant 0 : index
    %c0_62 = arith.constant 0 : index
    %102 = vector.load %arg5[%c0_60, %c0_61, %c0_62] : memref<9x4x32xbf16, #tpu.memory_space<vmem>>, vector<1x4x32xbf16>
    %103 = vector.shape_cast %102 : vector<1x4x32xbf16> to vector<4x32xbf16>
    %104 = arith.truncf %101 : vector<32x256xf32> to vector<32x256xbf16>
    %cst_63 = arith.constant dense<0.000000e+00> : vector<4x256xf32>
    %105 = tpu.matmul %103, %104, %cst_63 {dimension_numbers = #tpu.dot_dimension_numbers<[1], [0], [0], [1], [0, 0, 1, 1], [], []>} : vector<4x32xbf16>, vector<32x256xbf16>, vector<4x256xf32> -> vector<4x256xf32>
    %106 = arith.addf %98, %105 : vector<4x256xf32>
    %c16_i32_64 = arith.constant 16 : i32
    %107 = tpu.dynamic_rotate %97 by %c16_i32_64 dim 1 : vector<32x256xf32>, i32 -> vector<32x256xf32>
    %108 = vector.broadcast %3 : vector<1x256xf32> to vector<32x256xf32>
    %109 = arith.mulf %107, %108 : vector<32x256xf32>
    %c1_65 = arith.constant 1 : index
    %c0_66 = arith.constant 0 : index
    %c0_67 = arith.constant 0 : index
    %110 = vector.load %arg5[%c1_65, %c0_66, %c0_67] : memref<9x4x32xbf16, #tpu.memory_space<vmem>>, vector<1x4x32xbf16>
    %111 = vector.shape_cast %110 : vector<1x4x32xbf16> to vector<4x32xbf16>
    %112 = arith.truncf %109 : vector<32x256xf32> to vector<32x256xbf16>
    %cst_68 = arith.constant dense<0.000000e+00> : vector<4x256xf32>
    %113 = tpu.matmul %111, %112, %cst_68 {dimension_numbers = #tpu.dot_dimension_numbers<[1], [0], [0], [1], [0, 0, 1, 1], [], []>} : vector<4x32xbf16>, vector<32x256xbf16>, vector<4x256xf32> -> vector<4x256xf32>
    %114 = arith.addf %106, %113 : vector<4x256xf32>
    %c15_i32_69 = arith.constant 15 : i32
    %115 = tpu.dynamic_rotate %97 by %c15_i32_69 dim 1 : vector<32x256xf32>, i32 -> vector<32x256xf32>
    %116 = vector.broadcast %5 : vector<1x256xf32> to vector<32x256xf32>
    %117 = arith.mulf %115, %116 : vector<32x256xf32>
    %c2_70 = arith.constant 2 : index
    %c0_71 = arith.constant 0 : index
    %c0_72 = arith.constant 0 : index
    %118 = vector.load %arg5[%c2_70, %c0_71, %c0_72] : memref<9x4x32xbf16, #tpu.memory_space<vmem>>, vector<1x4x32xbf16>
    %119 = vector.shape_cast %118 : vector<1x4x32xbf16> to vector<4x32xbf16>
    %120 = arith.truncf %117 : vector<32x256xf32> to vector<32x256xbf16>
    %cst_73 = arith.constant dense<0.000000e+00> : vector<4x256xf32>
    %121 = tpu.matmul %119, %120, %cst_73 {dimension_numbers = #tpu.dot_dimension_numbers<[1], [0], [0], [1], [0, 0, 1, 1], [], []>} : vector<4x32xbf16>, vector<32x256xbf16>, vector<4x256xf32> -> vector<4x256xf32>
    %122 = arith.addf %114, %121 : vector<4x256xf32>
    %c1_i32_74 = arith.constant 1 : i32
    %123 = tpu.dynamic_rotate %97 by %c1_i32_74 dim 1 : vector<32x256xf32>, i32 -> vector<32x256xf32>
    %124 = vector.broadcast %7 : vector<1x256xf32> to vector<32x256xf32>
    %125 = arith.mulf %123, %124 : vector<32x256xf32>
    %c3_75 = arith.constant 3 : index
    %c0_76 = arith.constant 0 : index
    %c0_77 = arith.constant 0 : index
    %126 = vector.load %arg5[%c3_75, %c0_76, %c0_77] : memref<9x4x32xbf16, #tpu.memory_space<vmem>>, vector<1x4x32xbf16>
    %127 = vector.shape_cast %126 : vector<1x4x32xbf16> to vector<4x32xbf16>
    %128 = arith.truncf %125 : vector<32x256xf32> to vector<32x256xbf16>
    %cst_78 = arith.constant dense<0.000000e+00> : vector<4x256xf32>
    %129 = tpu.matmul %127, %128, %cst_78 {dimension_numbers = #tpu.dot_dimension_numbers<[1], [0], [0], [1], [0, 0, 1, 1], [], []>} : vector<4x32xbf16>, vector<32x256xbf16>, vector<4x256xf32> -> vector<4x256xf32>
    %130 = arith.addf %122, %129 : vector<4x256xf32>
    %c4_79 = arith.constant 4 : index
    %c0_80 = arith.constant 0 : index
    %c0_81 = arith.constant 0 : index
    %131 = vector.load %arg5[%c4_79, %c0_80, %c0_81] : memref<9x4x32xbf16, #tpu.memory_space<vmem>>, vector<1x4x32xbf16>
    %132 = vector.shape_cast %131 : vector<1x4x32xbf16> to vector<4x32xbf16>
    %133 = arith.truncf %97 : vector<32x256xf32> to vector<32x256xbf16>
    %cst_82 = arith.constant dense<0.000000e+00> : vector<4x256xf32>
    %134 = tpu.matmul %132, %133, %cst_82 {dimension_numbers = #tpu.dot_dimension_numbers<[1], [0], [0], [1], [0, 0, 1, 1], [], []>} : vector<4x32xbf16>, vector<32x256xbf16>, vector<4x256xf32> -> vector<4x256xf32>
    %135 = arith.addf %130, %134 : vector<4x256xf32>
    %c255_i32_83 = arith.constant 255 : i32
    %136 = tpu.dynamic_rotate %97 by %c255_i32_83 dim 1 : vector<32x256xf32>, i32 -> vector<32x256xf32>
    %137 = vector.broadcast %9 : vector<1x256xf32> to vector<32x256xf32>
    %138 = arith.mulf %136, %137 : vector<32x256xf32>
    %c5_84 = arith.constant 5 : index
    %c0_85 = arith.constant 0 : index
    %c0_86 = arith.constant 0 : index
    %139 = vector.load %arg5[%c5_84, %c0_85, %c0_86] : memref<9x4x32xbf16, #tpu.memory_space<vmem>>, vector<1x4x32xbf16>
    %140 = vector.shape_cast %139 : vector<1x4x32xbf16> to vector<4x32xbf16>
    %141 = arith.truncf %138 : vector<32x256xf32> to vector<32x256xbf16>
    %cst_87 = arith.constant dense<0.000000e+00> : vector<4x256xf32>
    %142 = tpu.matmul %140, %141, %cst_87 {dimension_numbers = #tpu.dot_dimension_numbers<[1], [0], [0], [1], [0, 0, 1, 1], [], []>} : vector<4x32xbf16>, vector<32x256xbf16>, vector<4x256xf32> -> vector<4x256xf32>
    %143 = arith.addf %135, %142 : vector<4x256xf32>
    %c241_i32_88 = arith.constant 241 : i32
    %144 = tpu.dynamic_rotate %97 by %c241_i32_88 dim 1 : vector<32x256xf32>, i32 -> vector<32x256xf32>
    %145 = vector.broadcast %11 : vector<1x256xf32> to vector<32x256xf32>
    %146 = arith.mulf %144, %145 : vector<32x256xf32>
    %c6_89 = arith.constant 6 : index
    %c0_90 = arith.constant 0 : index
    %c0_91 = arith.constant 0 : index
    %147 = vector.load %arg5[%c6_89, %c0_90, %c0_91] : memref<9x4x32xbf16, #tpu.memory_space<vmem>>, vector<1x4x32xbf16>
    %148 = vector.shape_cast %147 : vector<1x4x32xbf16> to vector<4x32xbf16>
    %149 = arith.truncf %146 : vector<32x256xf32> to vector<32x256xbf16>
    %cst_92 = arith.constant dense<0.000000e+00> : vector<4x256xf32>
    %150 = tpu.matmul %148, %149, %cst_92 {dimension_numbers = #tpu.dot_dimension_numbers<[1], [0], [0], [1], [0, 0, 1, 1], [], []>} : vector<4x32xbf16>, vector<32x256xbf16>, vector<4x256xf32> -> vector<4x256xf32>
    %151 = arith.addf %143, %150 : vector<4x256xf32>
    %c240_i32_93 = arith.constant 240 : i32
    %152 = tpu.dynamic_rotate %97 by %c240_i32_93 dim 1 : vector<32x256xf32>, i32 -> vector<32x256xf32>
    %153 = vector.broadcast %13 : vector<1x256xf32> to vector<32x256xf32>
    %154 = arith.mulf %152, %153 : vector<32x256xf32>
    %c7_94 = arith.constant 7 : index
    %c0_95 = arith.constant 0 : index
    %c0_96 = arith.constant 0 : index
    %155 = vector.load %arg5[%c7_94, %c0_95, %c0_96] : memref<9x4x32xbf16, #tpu.memory_space<vmem>>, vector<1x4x32xbf16>
    %156 = vector.shape_cast %155 : vector<1x4x32xbf16> to vector<4x32xbf16>
    %157 = arith.truncf %154 : vector<32x256xf32> to vector<32x256xbf16>
    %cst_97 = arith.constant dense<0.000000e+00> : vector<4x256xf32>
    %158 = tpu.matmul %156, %157, %cst_97 {dimension_numbers = #tpu.dot_dimension_numbers<[1], [0], [0], [1], [0, 0, 1, 1], [], []>} : vector<4x32xbf16>, vector<32x256xbf16>, vector<4x256xf32> -> vector<4x256xf32>
    %159 = arith.addf %151, %158 : vector<4x256xf32>
    %c239_i32_98 = arith.constant 239 : i32
    %160 = tpu.dynamic_rotate %97 by %c239_i32_98 dim 1 : vector<32x256xf32>, i32 -> vector<32x256xf32>
    %161 = vector.broadcast %15 : vector<1x256xf32> to vector<32x256xf32>
    %162 = arith.mulf %160, %161 : vector<32x256xf32>
    %c8_99 = arith.constant 8 : index
    %c0_100 = arith.constant 0 : index
    %c0_101 = arith.constant 0 : index
    %163 = vector.load %arg5[%c8_99, %c0_100, %c0_101] : memref<9x4x32xbf16, #tpu.memory_space<vmem>>, vector<1x4x32xbf16>
    %164 = vector.shape_cast %163 : vector<1x4x32xbf16> to vector<4x32xbf16>
    %165 = arith.truncf %162 : vector<32x256xf32> to vector<32x256xbf16>
    %cst_102 = arith.constant dense<0.000000e+00> : vector<4x256xf32>
    %166 = tpu.matmul %164, %165, %cst_102 {dimension_numbers = #tpu.dot_dimension_numbers<[1], [0], [0], [1], [0, 0, 1, 1], [], []>} : vector<4x32xbf16>, vector<32x256xbf16>, vector<4x256xf32> -> vector<4x256xf32>
    %167 = arith.addf %159, %166 : vector<4x256xf32>
    %c0_103 = arith.constant 0 : index
    %c0_104 = arith.constant 0 : index
    %168 = vector.load %arg6[%c0_103, %c0_104] : memref<4x1xf32, #tpu.memory_space<vmem>>, vector<4x1xf32>
    %169 = vector.broadcast %168 : vector<4x1xf32> to vector<4x256xf32>
    %170 = arith.addf %167, %169 : vector<4x256xf32>
    %c0_105 = arith.constant 0 : index
    %c0_106 = arith.constant 0 : index
    %c0_107 = arith.constant 0 : index
    %171 = vector.load %arg7[%c0_105, %c0_106, %c0_107] : memref<1x4x256xf32, #tpu.memory_space<vmem>>, vector<1x4x256xf32>
    %172 = vector.shape_cast %171 : vector<1x4x256xf32> to vector<4x256xf32>
    %173 = vector.shape_cast %170 : vector<4x256xf32> to vector<1x4x256xf32>
    tpu.vector_store %arg7[%c0_105, %c0_106, %c0_107], %173 {strides = array<i32>} : memref<1x4x256xf32, #tpu.memory_space<vmem>>, vector<1x4x256xf32>,
    return
  }
  func.func @transform_0(%arg0: i32) -> (i32, i32, i32) {
    %c0_i32 = arith.constant 0 : i32
    %c0_i32_0 = arith.constant 0 : i32
    %c0_i32_1 = arith.constant 0 : i32
    return %arg0, %c0_i32, %c0_i32_0 : i32, i32, i32
  }
  func.func @transform_1(%arg0: i32) -> (i32, i32, i32) {
    %c0_i32 = arith.constant 0 : i32
    %c0_i32_0 = arith.constant 0 : i32
    %c0_i32_1 = arith.constant 0 : i32
    %c0_i32_2 = arith.constant 0 : i32
    return %c0_i32, %c0_i32_0, %c0_i32_1 : i32, i32, i32
  }
  func.func @transform_2(%arg0: i32) -> (i32, i32, i32) {
    %c0_i32 = arith.constant 0 : i32
    %c0_i32_0 = arith.constant 0 : i32
    %c0_i32_1 = arith.constant 0 : i32
    %c0_i32_2 = arith.constant 0 : i32
    return %c0_i32, %c0_i32_0, %c0_i32_1 : i32, i32, i32
  }
  func.func @transform_3(%arg0: i32) -> (i32, i32, i32) {
    %c0_i32 = arith.constant 0 : i32
    %c0_i32_0 = arith.constant 0 : i32
    %c0_i32_1 = arith.constant 0 : i32
    return %arg0, %c0_i32, %c0_i32_0 : i32, i32, i32
  }
  func.func @transform_4(%arg0: i32) -> (i32, i32, i32) {
    %c0_i32 = arith.constant 0 : i32
    %c0_i32_0 = arith.constant 0 : i32
    %c0_i32_1 = arith.constant 0 : i32
    %c0_i32_2 = arith.constant 0 : i32
    return %c0_i32, %c0_i32_0, %c0_i32_1 : i32, i32, i32
  }
  func.func @transform_5(%arg0: i32) -> (i32, i32) {
    %c0_i32 = arith.constant 0 : i32
    %c0_i32_0 = arith.constant 0 : i32
    %c0_i32_1 = arith.constant 0 : i32
    return %c0_i32, %c0_i32_0 : i32, i32
  }
  func.func @transform_6(%arg0: i32) -> (i32, i32, i32) {
    %c0_i32 = arith.constant 0 : i32
    %c0_i32_0 = arith.constant 0 : i32
    %c0_i32_1 = arith.constant 0 : i32
    return %arg0, %c0_i32, %c0_i32_0 : i32, i32, i32
  }
}

</mosaic_0001>

<bundles_post_ra>
// kernel: tpu_custom_call.1
= control target key start
LH: loop header
LB: loop body
LE: loop exit
PB: predicated region body
PF: predicated region fallthrough
CT: control target
= control target key end

     0   :  { %11 = vsyncpa [#allocation3], 0  ;;  %s3476_s0 = inlined_call_operand.vmem [shape: f32[2,4,256], index: 0, kind: input, shape index: {}]   ;;  %s3477_s1 = inlined_call_operand.vmem [shape: f32[9,1,256], index: 1, kind: input, shape index: {}]   ;;  %s3478_s2 = inlined_call_operand.vmem [shape: bf16[9,32,4], index: 2, kind: input, shape index: {}]   ;;  %s3479_s3 = inlined_call_operand.vmem [shape: f32[2,32,1], index: 3, kind: input, shape index: {}]   ;;  %s3480_s4 = inlined_call_operand.vmem [shape: bf16[9,4,32], index: 4, kind: input, shape index: {}]   ;;  %s3481_s5 = inlined_call_operand.vmem [shape: f32[4,1], index: 5, kind: input, shape index: {}]   ;;  %s3482_s6 = inlined_call_operand.hbm [shape: f32[2,4,256], index: 6, kind: output, shape index: {}]  }
   0x1   :  { %13 = vsyncpa [#allocation3 + $0x1], 0  ;;  %s2554_s21 = smov 0   ;;  %s2556_s22 = smov 0  }
   0x2   :  { %s2558_s23 = smov 0   ;;  %s2560_s24 = smov 0  }
   0x3 LB: > { %s2575_s25 = sadd.s32 4294967295, %s2507_s24   ;;  %s2154_s26 = sadd.s32 4294967294, %s2507_s24   ;;  %s2507_s24 = sphi %s2560_s24, %s3508_s24   ;;  %s2503_s23 = sphi %s2558_s23, %s3507_s23   ;;  %s2499_s22 = sphi %s2556_s22, %s3506_s22   ;;  %s2495_s21 = sphi %s2554_s21, %s3505_s21  }
   0x4   : > { %s2579_s27 = sadd.s32 1, %s2507_s24   ;;  %s162_s28 = sadd.s32 1, %s2503_s23 }
   0x5   : > { %s159_s29 = ssub.s32 %s2507_s24, %s2579_s27  ;;  %p172_p0 = scmp.ne.s32.totalorder %s2503_s23, %s2499_s22 }
   0x6   : > { %p160_p1 = scmp.eq.s32.totalorder %s159_s29, 0  ;;  %p173_p2 = scmp.eq.s32.totalorder %s2575_s25, 1 }
   0x7   : > { %p178_p3 = scmp.ne.s32.totalorder %s2499_s22, %s2495_s21  ;;  %p179_p4 = scmp.eq.s32.totalorder %s2154_s26, 1 }
   0x8   : > { %s2590_s30 = scalar_select %p160_p1, %s2503_s23, %s162_s28  }
   0x9   : > { %p2592_p5 = por %p173_p2, %p172_p0  ;;  %p2596_p6 = por %p179_p4, %p178_p3 }
   0xa   : > { %p2157_p7 = scmp.ge.s32.totalorder %s2507_s24, 1  ;;  %p225_p8 = scmp.lt.s32.totalorder %s2507_s24, 3 }
   0xc   : > { %p226_p9 = pnand %p2157_p7, %p225_p8 }
   0xe   : > { %229 = sbr.rel (%p226_p9) target bundleno = 979 (0x3d3), region = 44 }
  0x15   : > { %p260_p10 = scmp.lt.s32.totalorder %s2575_s25, 1  ;;  %v3483_v1 = vmov 0   ;;  %s2510_s14 = smov 15   ;;  %v294_v3 = vlaneseq  ;;  %v2164_v12 = vld [vmem:[%s3477_s1 + $0x4] sm:$0x3]  ;;  %vm362_vm2 = vcmask 1041408  }
  0x16   : > { %578 = vmatprep.mubr.bf16.mxu0 %v3483_v1  ;;  %s2511_s15 = smov 1   ;;  %401 = vmatprep.mubr.bf16.mxu1 %v3483_v1  ;;  %s2512_s16 = smov 127   ;;  %v2165_v13 = vld [vmem:[%s3477_s1 + $0x6] sm:$0x3]  ;;  %vm355_vm3 = vcmask 31744   ;;  %v2396_v50 = vld [vmem:[%s3478_s2 + $0x28] sm:$0xff]  }
  0x17   : > { %s2604_s9 = scalar_select %p260_p10, %s2575_s25, 1  ;;  %2393 = vset.pattern.permute.xlu1 %v3483_v1  ;;  %2392 = vset.pattern.permute.xlu0 %v3483_v1  ;;  %v301_v6 = vshrl.u32 %v294_v3, 7  ;;  %v2656_v9 = vand.u32 127, %v294_v3  ;;  %v2395_v37 = vld [vmem:[%s3478_s2 + $0x20] sm:$0xff]   ;;  %v2166_v47 = vld [vmem:[%s3477_s1 + $0xa] sm:$0x3] }
  0x18   : > { %s2513_s17 = smov 113   ;;  %s2514_s18 = smov 16   ;;  %v2163_v38 = vld [vmem:[%s3477_s1 + $0x2] sm:$0x3]  ;;  %v271_v53 = vld [vmem:[%s3477_s1] sm:$0x3] }
  0x19   : > { %s2277_s10 = sshll.u32 %s2604_s9, 3  ;;  %s2515_s19 = smov 112   ;;  %v2658_v10 = vsub.s32 0, %v301_v6  ;;  %v2660_v11 = vsub.s32 1, %v301_v6  ;;  %vm501_vm0 = vcmp.lt.s32.totalorder %v2656_v9, 15  ;;  %vm611_vm1 = vcmp.lt.s32.totalorder %v2656_v9, 1 }
  0x1a   : > { %s264_s13 = scalar_lea.vmem %s3476_s0, %s2277_s10  ;;  %s2516_s20 = smov 17   ;;  %vm322_vm4 = vcmp.lt.s32.totalorder %v2656_v9, 16  ;;  %vm811_vm5 = vcmp.lt.s32.totalorder %v2656_v9, 127  ;;  %v2403_v61 = vld [vmem:[%s3478_s2 + $0x10] sm:$0xff]   ;;  %vm296_vm6 = vcmp.lt.s32.totalorder %v2656_v9, 17  ;;  %vm921_vm7 = vcmp.lt.s32.totalorder %v2656_v9, 113 }
  0x1b   : > { %v2610_v0 = vld [vmem:[%s264_s13] sm:$0xff]  ;;  %s2517_s26 = smov 111   ;;  %s2278_s28 = sshll.u32 %s2604_s9, 5  ;;  %v2671_v16 = vrot.slane %v2164_v12, %v2658_v10  ;;  %v2674_v17 = vrot.slane %v2165_v13, %v2658_v10  ;;  %v2677_v18 = vrot.slane %v2165_v13, %v2660_v11  ;;  %v2680_v19 = vrot.slane %v2164_v12, %v2660_v11 }
  0x1c   : > { %497 = vrot.lane.b32.xlu0 %v2610_v0, %s2510_s14  ;;  %607 = vrot.lane.b32.xlu1 %v2610_v0, %s2511_s15  ;;  %v2619_v2 = vcombine.high %v2610_v0, %v2610_v0  ;;  %s269_s11 = scalar_lea.vmem %s3479_s3, %s2278_s28  ;;  %v2717_v43 = vrot.slane %v2163_v38, %v2658_v10  ;;  %v2720_v44 = vrot.slane %v2163_v38, %v2660_v11  ;;  %vm1031_vm8 = vcmp.lt.s32.totalorder %v2656_v9, 112 }
  0x1d   : > { %v1248_v4 = vld [vmem:[%s269_s11 + $0x8] sm:$0xff]  ;;  %v1247_v5 = vld [vmem:[%s269_s11] sm:$0xff]  ;;  %v1249_v7 = vld [vmem:[%s269_s11 + $0x10] sm:$0xff]  ;;  %v2741_v54 = vrot.slane %v2166_v47, %v2660_v11  ;;  %v2759_v62 = vrot.slane %v271_v53, %v2658_v10  ;;  %v2762_v63 = vrot.slane %v271_v53, %v2660_v11  ;;  %vm1141_vm9 = vcmp.lt.s32.totalorder %v2656_v9, 111 }
  0x1e   : > { %v1250_v8 = vld [vmem:[%s269_s11 + $0x18] sm:$0xff]  ;;  %v723_v40 = vpack.c.bf16 %v2619_v2, %v2619_v2  ;;  %v2169_v53 = vld [vmem:[%s3477_s1 + $0x10] sm:$0x3]  ;;  %vm1410_vm10 = vcmask 261120  }
  0x1f   : > { %v2270_v9 = vld [vmem:[%s3480_s4 + $0x10] sm:$0x3] }
  0x20   : > { %499 = vrot.lane.b32.xlu0 %v2619_v2, %s2510_s14  ;;  %609 = vrot.lane.b32.xlu1 %v2619_v2, %s2511_s15 }
  0x24   : > { %809 = vrot.lane.b32.xlu1 %v2619_v2, %s2512_s16  ;;  %807 = vrot.lane.b32.xlu0 %v2610_v0, %s2512_s16 }
  0x28   : > { %919 = vrot.lane.b32.xlu1 %v2619_v2, %s2513_s17  ;;  %917 = vrot.lane.b32.xlu0 %v2610_v0, %s2513_s17 }
  0x2c   : > { %320 = vrot.lane.b32.xlu1 %v2619_v2, %s2514_s18  ;;  %318 = vrot.lane.b32.xlu0 %v2610_v0, %s2514_s18 }
  0x30   : > { %1029 = vrot.lane.b32.xlu1 %v2619_v2, %s2515_s19  ;;  %1027 = vrot.lane.b32.xlu0 %v2610_v0, %s2515_s19 }
  0x34   : > { %292 = vrot.lane.b32.xlu1 %v2619_v2, %s2516_s20  ;;  %290 = vrot.lane.b32.xlu0 %v2610_v0, %s2516_s20 }
  0x38   : > { %1139 = vrot.lane.b32.xlu1 %v2619_v2, %s2517_s26  ;;  %1137 = vrot.lane.b32.xlu0 %v2610_v0, %s2517_s26  ;;  %v722_v2 = vpack.c.bf16 %v2610_v0, %v2610_v0 }
  0x3a   : > { %v741_v13 = vsel %vm362_vm2, %v722_v2, 0 }
  0x3c   : > { %1258 = vperm.xlu1 %2393, %v1248_v4   ;;  %1253 = vperm.xlu0 %2392, %v1247_v5  }
  0x40   : > { %1263 = vperm.xlu1 %2393, %v1249_v7   ;;  %1268 = vperm.xlu0 %2392, %v1250_v8   ;;  %v2397_v8 = vld [vmem:[%s3478_s2 + $0x30] sm:$0xff]  }
  0x8e   : > { %v498_v14 = vpop.permute.xlu0 %497  ;;  %v608_v15 = vpop.permute.xlu1 %607 }
  0x92   : > { %v500_v20 = vpop.permute.xlu0 %499  ;;  %v610_v21 = vpop.permute.xlu1 %609 }
  0x93   : > { %v502_v22 = vsel %vm501_vm0, %v498_v14, %v500_v20  ;;  %v503_v23 = vsel %vm501_vm0, %v500_v20, %v498_v14  ;;  %v612_v24 = vsel %vm611_vm1, %v608_v15, %v610_v21  ;;  %v613_v25 = vsel %vm611_vm1, %v610_v21, %v608_v15  ;;  %v2405_v21 = vld [vmem:[%s3478_s2 + $0x18] sm:$0xff]  }
  0x94   : > { %v515_v26 = vmul.f32 %v2671_v16, %v503_v23  ;;  %v625_v27 = vmul.f32 %v2674_v17, %v613_v25  ;;  %v626_v28 = vmul.f32 %v2677_v18, %v612_v24  ;;  %v516_v29 = vmul.f32 %v2680_v19, %v502_v22  ;;  %v2167_v25 = vld [vmem:[%s3477_s1 + $0xc] sm:$0x3] }
  0x95   : > { %v2788_v23 = vrot.slane %v2166_v47, %v2658_v10 }
  0x96   : > { %v632_v30 = vpack.c.bf16 %v625_v27, %v625_v27  ;;  %v633_v31 = vpack.c.bf16 %v626_v28, %v626_v28  ;;  %v523_v32 = vpack.c.bf16 %v516_v29, %v516_v29  ;;  %v522_v33 = vpack.c.bf16 %v515_v26, %v515_v26  ;;  %v2694_v34 = vpop.permute.xlu1 %809  ;;  %v2696_v35 = vpop.permute.xlu0 %807  ;;  %v2398_v26 = vld [vmem:[%s3478_s2 + $0x38] sm:$0xff]  }
  0x97   : > { %v813_v59 = vsel %vm811_vm5, %v2694_v34, %v2696_v35  ;;  %v812_v24 = vsel %vm811_vm5, %v2696_v35, %v2694_v34  ;;  %v2806_v28 = vrot.slane %v2167_v25, %v2660_v11 }
  0x98   : > { %2190 = vmatprep.subr.msk.bf16.mxu0 %vm362_vm2, %v523_v32  ;;  %v541_v36 = vsel %vm362_vm2, %v522_v33, 0  ;;  %v651_v39 = vsel %vm362_vm2, %v632_v30, 0  ;;  %v826_v3 = vmul.f32 %v2741_v54, %v813_v59  ;;  %v825_v27 = vmul.f32 %v2788_v23, %v812_v24  ;;  %v2407_v30 = vld [vmem:[%s3478_s2] sm:$0xff]  }
  0x99   : > { %547 = vmatpush1.bf16.msra.mxu0 %v541_v36  ;;  %v2399_v33 = vld [vmem:[%s3478_s2 + $0x40] sm:$0xff]   ;;  %v2409_v36 = vld [vmem:[%s3478_s2 + $0x8] sm:$0xff]  }
  0x9a   : > { %2199 = vmatprep.subr.msk.bf16.mxu0 %vm362_vm2, %v633_v31  ;;  %v2710_v41 = vpop.permute.xlu1 %919  ;;  %v2712_v42 = vpop.permute.xlu0 %917  ;;  %v833_v14 = vpack.c.bf16 %v826_v3, %v826_v3  ;;  %v832_v31 = vpack.c.bf16 %v825_v27, %v825_v27  ;;  %v2404_v3 = vld [vmem:[%s3478_s2 + $0x60] sm:$0xff]  }
  0x9b   : > { %v923_v29 = vsel %vm921_vm7, %v2710_v41, %v2712_v42  ;;  %v922_v38 = vsel %vm921_vm7, %v2712_v42, %v2710_v41 }
  0x9c   : > { %2191 = vmatmul.mubr.msk.bf16.vlgmr.msra.gmra.mrb[0].mxu0 %vm355_vm3, %v2395_v37  ;;  %v936_v32 = vmul.f32 %v2806_v28, %v923_v29  ;;  %v851_v34 = vsel %vm362_vm2, %v832_v31, 0  ;;  %v2830_v37 = vrot.slane %v2167_v25, %v2658_v10 }
  0x9d   : > { %657 = vmatpush1.bf16.msra.mxu0 %v651_v39  ;;  %588 = vmatprep.mubr.bf16.mxu0 %v3483_v1  ;;  %v2168_v39 = vld [vmem:[%s3477_s1 + $0xe] sm:$0x3] }
  0x9e   : > { %2208 = vmatprep.subr.msk.bf16.mxu0 %vm362_vm2, %v723_v40  ;;  %v321_v45 = vpop.permute.xlu1 %320  ;;  %v319_v46 = vpop.permute.xlu0 %318  ;;  %v943_v35 = vpack.c.bf16 %v936_v32, %v936_v32  ;;  %v2400_v40 = vld [vmem:[%s3478_s2 + $0x48] sm:$0xff]  }
  0x9f   : > { %v323_v48 = vsel %vm322_vm4, %v319_v46, %v321_v45  ;;  %v324_v49 = vsel %vm322_vm4, %v321_v45, %v319_v46  ;;  %v935_v45 = vmul.f32 %v2830_v37, %v922_v38  ;;  %v2848_v46 = vrot.slane %v2168_v39, %v2660_v11 }
  0xa0   : > { %v336_v51 = vmul.f32 %v2717_v43, %v324_v49  ;;  %v337_v52 = vmul.f32 %v2720_v44, %v323_v48  ;;  %v2401_v48 = vld [vmem:[%s3478_s2 + $0x50] sm:$0xff]  }
  0xa1   : > { %v942_v42 = vpack.c.bf16 %v935_v45, %v935_v45 }
  0xa2   : > { %v344_v55 = vpack.c.bf16 %v337_v52, %v337_v52  ;;  %v343_v56 = vpack.c.bf16 %v336_v51, %v336_v51  ;;  %v2743_v57 = vpop.permute.xlu1 %1029  ;;  %v2745_v58 = vpop.permute.xlu0 %1027  ;;  %v2864_v51 = vrot.slane %v2168_v39, %v2658_v10 }
  0xa3   : > { %v1033_v41 = vsel %vm1031_vm8, %v2743_v57, %v2745_v58  ;;  %v961_v49 = vsel %vm362_vm2, %v942_v42, 0  ;;  %v1032_v52 = vsel %vm1031_vm8, %v2745_v58, %v2743_v57 }
  0xa4   : > { %2192 = vmatmul.mubr.msk.bf16.gmra.mrb[4].mxu0 %vm355_vm3, %v2396_v50  ;;  %2176 = vmatprep.subr.msk.bf16.mxu1 %vm362_vm2, %v344_v55  ;;  %v364_v60 = vsel %vm362_vm2, %v343_v56, 0  ;;  %v1046_v47 = vmul.f32 %v2848_v46, %v1033_v41  ;;  %3493 = vst [vmem:[#allocation5_spill] sm:$0xff] %v2864_v51  ;;  %v2402_v55 = vld [vmem:[%s3478_s2 + $0x58] sm:$0xff]  }
  0xa5   : > { %688 = vmatprep.mubr.bf16.mxu0 %v3483_v1  ;;  %370 = vmatpush1.bf16.msra.mxu1 %v364_v60  ;;  %v1045_v60 = vmul.f32 %v2864_v51, %v1032_v52 }
  0xa6   : > { %v293_v4 = vpop.permute.xlu1 %292  ;;  %v291_v5 = vpop.permute.xlu0 %290  ;;  %v1053_v50 = vpack.c.bf16 %v1046_v47, %v1046_v47 }
  0xa7   : > { %v297_v6 = vsel %vm296_vm6, %v291_v5, %v293_v4  ;;  %v298_v7 = vsel %vm296_vm6, %v293_v4, %v291_v5  ;;  %v1052_v58 = vpack.c.bf16 %v1045_v60, %v1045_v60 }
  0xa8   : > { %2177 = vmatmul.mubr.msk.bf16.vlgmr.msra.gmra.mrb[0].mxu1 %vm355_vm3, %v2403_v61  ;;  %v310_v12 = vmul.f32 %v2759_v62, %v298_v7  ;;  %v311_v0 = vmul.f32 %v2762_v63, %v297_v6  ;;  %v2880_v61 = vrot.slane %v2169_v53, %v2660_v11  ;;  %v2894_v11 = vrot.slane %v2169_v53, %v2658_v10  ;;  %v2406_v7 = vld [vmem:[%s3478_s2 + $0x68] sm:$0xff]   ;;  %v2408_v10 = vld [vmem:[%s3478_s2 + $0x70] sm:$0xff]  }
  0xa9   : > { %411 = vmatprep.mubr.bf16.mxu1 %v3483_v1  ;;  %v1071_v4 = vsel %vm362_vm2, %v1052_v58, 0 }
  0xaa   : > { %v316_v15 = vpack.c.bf16 %v310_v12, %v310_v12  ;;  %v317_v20 = vpack.c.bf16 %v311_v0, %v311_v0  ;;  %v1140_v56 = vpop.permute.xlu1 %1139  ;;  %v1138_v59 = vpop.permute.xlu0 %1137  ;;  %3494 = vst [vmem:[#allocation6_spill] sm:$0xff] %v2880_v61  ;;  %3495 = vst [vmem:[#allocation7_spill] sm:$0xff] %v2894_v11 }
  0xab   : > { %v1143_v57 = vsel %vm1141_vm9, %v1140_v56, %v1138_v59  ;;  %v1142_v6 = vsel %vm1141_vm9, %v1138_v59, %v1140_v56 }
  0xac   : > { %2200 = vmatmul.mubr.msk.bf16.vlgmr.msra.gmra.mrb[0].mxu0 %vm355_vm3, %v2397_v8  ;;  %2181 = vmatprep.subr.msk.bf16.mxu1 %vm362_vm2, %v317_v20  ;;  %v439_v22 = vsel %vm362_vm2, %v316_v15, 0  ;;  %v1156_v2 = vmul.f32 %v2880_v61, %v1143_v57  ;;  %v1155_v8 = vmul.f32 %v2894_v11, %v1142_v6  ;;  %v2412_v15 = vld [vmem:[%s3478_s2 + $0x88] sm:$0xff]  }
  0xad   : > { %747 = vmatpush1.bf16.msra.mxu0 %v741_v13  ;;  %698 = vmatprep.mubr.bf16.mxu0 %v3483_v1  ;;  %v2410_v13 = vld [vmem:[%s3478_s2 + $0x78] sm:$0xff]  }
  0xae   : > { %2217 = vmatprep.subr.msk.bf16.mxu0 %vm362_vm2, %v833_v14  ;;  %445 = vmatpush1.bf16.msra.mxu1 %v439_v22  ;;  %v1163_v5 = vpack.c.bf16 %v1156_v2, %v1156_v2  ;;  %v1162_v12 = vpack.c.bf16 %v1155_v8, %v1155_v8  ;;  %v2411_v14 = vld [vmem:[%s3478_s2 + $0x80] sm:$0xff]  }
  0xb0   : > { %2178 = vmatmul.mubr.msk.bf16.gmra.mrb[4].mxu1 %vm355_vm3, %v2405_v21  ;;  %v1181_v0 = vsel %vm362_vm2, %v1162_v12, 0 }
  0xb1   : > { %476 = vmatprep.mubr.bf16.mxu1 %v3483_v1 }
  0xb4   : > { %2201 = vmatmul.mubr.msk.bf16.gmra.mrb[4].mxu0 %vm355_vm3, %v2398_v26 }
  0xb5   : > { %778 = vmatprep.mubr.bf16.mxu0 %v3483_v1 }
  0xb8   : > { %2182 = vmatmul.mubr.msk.bf16.vlgmr.msra.gmra.mrb[0].mxu1 %vm355_vm3, %v2407_v30 }
  0xb9   : > { %486 = vmatprep.mubr.bf16.mxu1 %v3483_v1 }
  0xbc   : > { %2209 = vmatmul.mubr.msk.bf16.vlgmr.msra.gmra.mrb[0].mxu0 %vm355_vm3, %v2399_v33  ;;  %v1254_v33 = vpop.permute.xlu0 %1253 }
  0xbd   : > { %857 = vmatpush1.bf16.msra.mxu0 %v851_v34  ;;  %788 = vmatprep.mubr.bf16.mxu0 %v3483_v1 }
  0xbe   : > { %2226 = vmatprep.subr.msk.bf16.mxu0 %vm362_vm2, %v943_v35 }
  0xc0   : > { %2183 = vmatmul.mubr.msk.bf16.gmra.mrb[4].mxu1 %vm355_vm3, %v2409_v36 }
  0xc1   : > { %1446 = vmatprep.mubr.bf16.mxu1 %v3483_v1 }
  0xc4   : > { %2210 = vmatmul.mubr.msk.bf16.gmra.mrb[4].mxu0 %vm355_vm3, %v2400_v40  ;;  %v1259_v40 = vpop.permute.xlu1 %1258 }
  0xc5   : > { %888 = vmatprep.mubr.bf16.mxu0 %v3483_v1 }
  0xcc   : > { %2218 = vmatmul.mubr.msk.bf16.vlgmr.msra.gmra.mrb[0].mxu0 %vm355_vm3, %v2401_v48 }
  0xcd   : > { %967 = vmatpush1.bf16.msra.mxu0 %v961_v49  ;;  %898 = vmatprep.mubr.bf16.mxu0 %v3483_v1 }
  0xce   : > { %2235 = vmatprep.subr.msk.bf16.mxu0 %vm362_vm2, %v1053_v50 }
  0xd4   : > { %2219 = vmatmul.mubr.msk.bf16.gmra.mrb[4].mxu0 %vm355_vm3, %v2402_v55 }
  0xd5   : > { %998 = vmatprep.mubr.bf16.mxu0 %v3483_v1 }
  0xdc   : > { %2227 = vmatmul.mubr.msk.bf16.vlgmr.msra.gmra.mrb[0].mxu0 %vm355_vm3, %v2404_v3 }
  0xdd   : > { %1077 = vmatpush1.bf16.msra.mxu0 %v1071_v4  ;;  %1008 = vmatprep.mubr.bf16.mxu0 %v3483_v1 }
  0xde   : > { %2244 = vmatprep.subr.msk.bf16.mxu0 %vm362_vm2, %v1163_v5 }
  0xe4   : > { %2228 = vmatmul.mubr.msk.bf16.gmra.mrb[4].mxu0 %vm355_vm3, %v2406_v7 }
  0xe5   : > { %1108 = vmatprep.mubr.bf16.mxu0 %v3483_v1 }
  0xec   : > { %2236 = vmatmul.mubr.msk.bf16.vlgmr.msra.gmra.mrb[0].mxu0 %vm355_vm3, %v2408_v10 }
  0xed   : > { %1187 = vmatpush1.bf16.msra.mxu0 %v1181_v0  ;;  %1118 = vmatprep.mubr.bf16.mxu0 %v3483_v1  ;;  %v1264_v0 = vpop.permute.xlu1 %1263 }
  0xf4   : > { %2237 = vmatmul.mubr.msk.bf16.gmra.mrb[4].mxu0 %vm355_vm3, %v2410_v13 }
  0xf5   : > { %1218 = vmatprep.mubr.bf16.mxu0 %v3483_v1 }
  0xfc   : > { %2245 = vmatmul.mubr.msk.bf16.vlgmr.msra.gmra.mrb[0].mxu0 %vm355_vm3, %v2411_v14 }
  0xfd   : > { %1228 = vmatprep.mubr.bf16.mxu0 %v3483_v1 }
 0x104   : > { %2246 = vmatmul.mubr.msk.bf16.gmra.mrb[4].mxu0 %vm355_vm3, %v2412_v15 }
 0x18b   : > { %v478_v20 = vpop.f32.mrb[0].mxu1 }
 0x18c   : > { %v480_v21 = vpop.f32.mrb[1].mxu1 }
 0x18d   : > { %v482_v22 = vpop.f32.mrb[2].mxu1 }
 0x18e   : > { %v484_v24 = vpop.f32.mrb[3].mxu1 }
 0x193   : > { %v488_v25 = vpop.f32.mrb[4].mxu1 }
 0x194   : > { %v490_v26 = vpop.f32.mrb[5].mxu1 }
 0x195   : > { %v492_v27 = vpop.f32.mrb[6].mxu1 }
 0x196   : > { %v494_v29 = vpop.f32.mrb[7].mxu1 }
 0x1cf   : > { %v1220_v30 = vpop.f32.mrb[0].mxu0 }
 0x1d0   : > { %v2280_v31 = vadd.f32 %v1220_v30, %v478_v20  ;;  %v1222_v32 = vpop.f32.mrb[1].mxu0 }
 0x1d1   : > { %v2281_v34 = vadd.f32 %v1222_v32, %v480_v21  ;;  %v1224_v35 = vpop.f32.mrb[2].mxu0  ;;  %v1269_v21 = vpop.permute.xlu0 %1268 }
 0x1d2   : > { %v1271_v36 = vadd.f32 %v2280_v31, %v1254_v33  ;;  %v2282_v38 = vadd.f32 %v1224_v35, %v482_v22  ;;  %v1226_v39 = vpop.f32.mrb[3].mxu0 }
 0x1d3   : > { %v2283_v45 = vadd.f32 %v1226_v39, %v484_v24  ;;  %v1272_v60 = vadd.f32 %v2281_v34, %v1254_v33 }
 0x1d4   : > { %v2247_v41 = vmul.f32 -1.442695, %v1271_v36  ;;  %v1273_v42 = vadd.f32 %v2282_v38, %v1259_v40 }
 0x1d5   : > { %v1274_v57 = vadd.f32 %v2283_v45, %v1259_v40  ;;  %v2248_v2 = vmul.f32 -1.442695, %v1272_v60 }
 0x1d6   : > { %2413 = vpow2.f32 %v2247_v41  ;;  %v2249_v47 = vmul.f32 -1.442695, %v1273_v42 }
 0x1d7   : > { %v1230_v48 = vpop.f32.mrb[4].mxu0  ;;  %v2250_v5 = vmul.f32 -1.442695, %v1274_v57 }
 0x1d8   : > { %2415 = vpow2.f32 %v2249_v47  ;;  %v2284_v49 = vadd.f32 %v1230_v48, %v488_v25  ;;  %v1232_v50 = vpop.f32.mrb[5].mxu0 }
 0x1d9   : > { %v2285_v52 = vadd.f32 %v1232_v50, %v490_v26  ;;  %v1234_v53 = vpop.f32.mrb[6].mxu0 }
 0x1da   : > { %v2286_v55 = vadd.f32 %v1234_v53, %v492_v27  ;;  %v1236_v56 = vpop.f32.mrb[7].mxu0  ;;  %v1275_v15 = vadd.f32 %v2284_v49, %v1264_v0 }
 0x1db   : > { %v2287_v59 = vadd.f32 %v1236_v56, %v494_v29  ;;  %v1276_v34 = vadd.f32 %v2285_v52, %v1264_v0 }
 0x1dc   : > { %v1277_v22 = vadd.f32 %v2286_v55, %v1269_v21  ;;  %v2251_v25 = vmul.f32 -1.442695, %v1275_v15 }
 0x1dd   : > { %v2252_v39 = vmul.f32 -1.442695, %v1276_v34 }
 0x1de   : > { %v2253_v26 = vmul.f32 -1.442695, %v1277_v22 }
 0x1e0   : > { %v2414_v58 = vpop.eup %2413 }
 0x1e1   : > { %v1303_v3 = vadd.f32 1.0, %v2414_v58 }
 0x1e2   : > { %v2416_v4 = vpop.eup %2415 }
 0x1e3   : > { %2417 = vrcp.f32 %v1303_v3  ;;  %v1305_v6 = vadd.f32 1.0, %v2416_v4 }
 0x1e4   : > { %2419 = vpow2.f32 %v2248_v2 }
 0x1e5   : > { %2421 = vrcp.f32 %v1305_v6 }
 0x1e6   : > { %2423 = vpow2.f32 %v2250_v5  ;;  %v2055_v5 = vld [vmem:[%s3481_s5] sm:$0xf] }
 0x1ed   : > { %v2418_v7 = vpop.eup %2417 }
 0x1ee   : > { %v2420_v8 = vpop.eup %2419  ;;  %v2925_v12 = vmul.f32 %v2418_v7, %v1271_v36  ;;  %v1278_v36 = vadd.f32 %v2287_v59, %v1269_v21 }
 0x1ef   : > { %v2422_v10 = vpop.eup %2421  ;;  %v1304_v20 = vadd.f32 1.0, %v2420_v8 }
 0x1f0   : > { %v2424_v13 = vpop.eup %2423  ;;  %v2927_v14 = vmul.f32 %v2422_v10, %v1273_v42  ;;  %1372 = vrot.lane.b32.xlu1 %v2925_v12, %s2514_s18  ;;  %v2254_v40 = vmul.f32 -1.442695, %v1278_v36 }
 0x1f1   : > { %v1306_v24 = vadd.f32 1.0, %v2424_v13  ;;  %2425 = vrcp.f32 %v1304_v20 }
 0x1f2   : > { %1374 = vrot.lane.b32.xlu0 %v2927_v14, %s2514_s18 }
 0x1f3   : > { %2427 = vrcp.f32 %v1306_v24 }
 0x1f4   : > { %1335 = vrot.lane.b32.xlu1 %v2925_v12, %s2516_s20  ;;  %2429 = vpow2.f32 %v2251_v25 }
 0x1f5   : > { %2431 = vpow2.f32 %v2253_v26 }
 0x1f6   : > { %1337 = vrot.lane.b32.xlu0 %v2927_v14, %s2516_s20 }
 0x1f8   : > { %1499 = vrot.lane.b32.xlu1 %v2925_v12, %s2510_s14 }
 0x1fa   : > { %1501 = vrot.lane.b32.xlu0 %v2927_v14, %s2510_s14 }
 0x1fb   : > { %v2426_v27 = vpop.eup %2425 }
 0x1fc   : > { %1583 = vrot.lane.b32.xlu1 %v2925_v12, %s2511_s15  ;;  %v2947_v31 = vmul.f32 %v2426_v27, %v1272_v60 }
 0x1fd   : > { %v2428_v29 = vpop.eup %2427 }
 0x1fe   : > { %1585 = vrot.lane.b32.xlu0 %v2927_v14, %s2511_s15  ;;  %v2430_v30 = vpop.eup %2429  ;;  %v2951_v33 = vmul.f32 %v2428_v29, %v1274_v57 }
 0x1ff   : > { %v2432_v32 = vpop.eup %2431  ;;  %v1307_v35 = vadd.f32 1.0, %v2430_v30 }
 0x200   : > { %1719 = vrot.lane.b32.xlu1 %v2925_v12, %s2512_s16  ;;  %v1309_v38 = vadd.f32 1.0, %v2432_v32 }
 0x201   : > { %2433 = vrcp.f32 %v1307_v35 }
 0x202   : > { %1721 = vrot.lane.b32.xlu0 %v2927_v14, %s2512_s16  ;;  %2435 = vrcp.f32 %v1309_v38 }
 0x203   : > { %2437 = vpow2.f32 %v2252_v39 }
 0x204   : > { %1380 = vrot.lane.b32.xlu1 %v2947_v31, %s2514_s18  ;;  %2439 = vpow2.f32 %v2254_v40 }
 0x206   : > { %1382 = vrot.lane.b32.xlu0 %v2951_v33, %s2514_s18 }
 0x208   : > { %1343 = vrot.lane.b32.xlu1 %v2947_v31, %s2516_s20 }
 0x20a   : > { %1345 = vrot.lane.b32.xlu0 %v2951_v33, %s2516_s20 }
 0x20b   : > { %v2434_v45 = vpop.eup %2433 }
 0x20c   : > { %1507 = vrot.lane.b32.xlu1 %v2947_v31, %s2510_s14  ;;  %v2436_v41 = vpop.eup %2435  ;;  %v2971_v47 = vmul.f32 %v2434_v45, %v1275_v15 }
 0x20d   : > { %v2438_v42 = vpop.eup %2437  ;;  %v2975_v49 = vmul.f32 %v2436_v41, %v1277_v22 }
 0x20e   : > { %1509 = vrot.lane.b32.xlu0 %v2951_v33, %s2510_s14  ;;  %v2440_v48 = vpop.eup %2439  ;;  %v1308_v50 = vadd.f32 1.0, %v2438_v42 }
 0x20f   : > { %v1310_v52 = vadd.f32 1.0, %v2440_v48 }
 0x210   : > { %1591 = vrot.lane.b32.xlu1 %v2947_v31, %s2511_s15  ;;  %2441 = vrcp.f32 %v1308_v50 }
 0x211   : > { %2443 = vrcp.f32 %v1310_v52 }
 0x212   : > { %1593 = vrot.lane.b32.xlu0 %v2951_v33, %s2511_s15 }
 0x214   : > { %1727 = vrot.lane.b32.xlu1 %v2947_v31, %s2512_s16 }
 0x216   : > { %1729 = vrot.lane.b32.xlu0 %v2951_v33, %s2512_s16 }
 0x218   : > { %1376 = vrot.lane.b32.xlu1 %v2971_v47, %s2514_s18 }
 0x21a   : > { %1378 = vrot.lane.b32.xlu0 %v2975_v49, %s2514_s18  ;;  %v2442_v53 = vpop.eup %2441 }
 0x21b   : > { %v2444_v55 = vpop.eup %2443  ;;  %v2995_v56 = vmul.f32 %v2442_v53, %v1276_v34 }
 0x21c   : > { %1339 = vrot.lane.b32.xlu1 %v2971_v47, %s2516_s20  ;;  %v2999_v59 = vmul.f32 %v2444_v55, %v1278_v36 }
 0x21e   : > { %1341 = vrot.lane.b32.xlu0 %v2975_v49, %s2516_s20 }
 0x220   : > { %1503 = vrot.lane.b32.xlu1 %v2971_v47, %s2510_s14 }
 0x222   : > { %1505 = vrot.lane.b32.xlu0 %v2975_v49, %s2510_s14 }
 0x224   : > { %1587 = vrot.lane.b32.xlu1 %v2971_v47, %s2511_s15 }
 0x226   : > { %1589 = vrot.lane.b32.xlu0 %v2975_v49, %s2511_s15 }
 0x228   : > { %1723 = vrot.lane.b32.xlu1 %v2971_v47, %s2512_s16 }
 0x22a   : > { %1725 = vrot.lane.b32.xlu0 %v2975_v49, %s2512_s16 }
 0x22c   : > { %1384 = vrot.lane.b32.xlu1 %v2995_v56, %s2514_s18 }
 0x22e   : > { %1386 = vrot.lane.b32.xlu0 %v2999_v59, %s2514_s18 }
 0x230   : > { %1803 = vrot.lane.b32.xlu1 %v2925_v12, %s2513_s17 }
 0x232   : > { %1805 = vrot.lane.b32.xlu0 %v2927_v14, %s2513_s17 }
 0x234   : > { %1347 = vrot.lane.b32.xlu1 %v2995_v56, %s2516_s20 }
 0x236   : > { %1349 = vrot.lane.b32.xlu0 %v2999_v59, %s2516_s20 }
 0x238   : > { %1511 = vrot.lane.b32.xlu1 %v2995_v56, %s2510_s14 }
 0x23a   : > { %1813 = vrot.lane.b32.xlu0 %v2951_v33, %s2513_s17 }
 0x23c   : > { %1595 = vrot.lane.b32.xlu1 %v2995_v56, %s2511_s15 }
 0x23e   : > { %1513 = vrot.lane.b32.xlu0 %v2999_v59, %s2510_s14 }
 0x240   : > { %1731 = vrot.lane.b32.xlu1 %v2995_v56, %s2512_s16 }
 0x242   : > { %1809 = vrot.lane.b32.xlu0 %v2975_v49, %s2513_s17 }
 0x244   : > { %1811 = vrot.lane.b32.xlu1 %v2947_v31, %s2513_s17 }
 0x246   : > { %1597 = vrot.lane.b32.xlu0 %v2999_v59, %s2511_s15 }
 0x248   : > { %1807 = vrot.lane.b32.xlu1 %v2971_v47, %s2513_s17 }
 0x24a   : > { %1889 = vrot.lane.b32.xlu0 %v2927_v14, %s2515_s19 }
 0x24c   : > { %1815 = vrot.lane.b32.xlu1 %v2995_v56, %s2513_s17 }
 0x24e   : > { %1897 = vrot.lane.b32.xlu0 %v2951_v33, %s2515_s19 }
 0x250   : > { %1887 = vrot.lane.b32.xlu1 %v2925_v12, %s2515_s19 }
 0x252   : > { %1893 = vrot.lane.b32.xlu0 %v2975_v49, %s2515_s19 }
 0x254   : > { %1895 = vrot.lane.b32.xlu1 %v2947_v31, %s2515_s19 }
 0x256   : > { %1733 = vrot.lane.b32.xlu0 %v2999_v59, %s2512_s16 }
 0x258   : > { %1891 = vrot.lane.b32.xlu1 %v2971_v47, %s2515_s19 }
 0x25a   : > { %1973 = vrot.lane.b32.xlu0 %v2927_v14, %s2517_s26 }
 0x25c   : > { %1899 = vrot.lane.b32.xlu1 %v2995_v56, %s2515_s19 }
 0x25e   : > { %1817 = vrot.lane.b32.xlu0 %v2999_v59, %s2513_s17 }
 0x260   : > { %1971 = vrot.lane.b32.xlu1 %v2925_v12, %s2517_s26 }
 0x262   : > { %v1373_v60 = vpop.permute.xlu1 %1372  ;;  %1981 = vrot.lane.b32.xlu0 %v2951_v33, %s2517_s26 }
 0x264   : > { %v1375_v57 = vpop.permute.xlu0 %1374  ;;  %1979 = vrot.lane.b32.xlu1 %v2947_v31, %s2517_s26 }
 0x266   : > { %v3059_v58 = vpop.permute.xlu1 %1335  ;;  %1901 = vrot.lane.b32.xlu0 %v2999_v59, %s2515_s19  ;;  %s257_s19 = sand.u32 1, %s2499_s22  }
 0x267   : > { %s2158_s20 = sshll.u32 %s257_s19, 3  ;;  %s2069_s12 = scalar_lea.sflag [#allocation3], %s257_s19 }
 0x268   : > { %v3063_v2 = vpop.permute.xlu0 %1337  ;;  %1975 = vrot.lane.b32.xlu1 %v2971_v47, %s2517_s26  ;;  %s259_s28 = scalar_lea.vmem [#allocation2], %s2158_s20 }
 0x269   : > { %s2083_s29 = sshll.u32 %s259_s28, 4  ;;  %s3436_s29 = int_to_ptr.vmem [resolvable:$true] %s2083_s29 }
 0x26a   : > { %v3067_v3 = vpop.permute.xlu1 %1499  ;;  %1977 = vrot.lane.b32.xlu0 %v2975_v49, %s2517_s26  ;;  %s2445_s13 = scalar_lea.vmem %s3436_s29, 128 }
 0x26b   : > { %p2446_p11 = scmp.ne.s32.totalorder %s3436_s29, %s2445_s13 }
 0x26c   : > { %v3071_v4 = vpop.permute.xlu0 %1501  ;;  %1983 = vrot.lane.b32.xlu1 %v2995_v56, %s2517_s26 }
 0x26d   : > { %p2447_p12 = pnand %p2446_p11, %p2592_p5 }
 0x26e   : > { %v1584_v6 = vpop.permute.xlu1 %1583  ;;  %1985 = vrot.lane.b32.xlu0 %v2999_v59, %s2517_s26  ;;  %s2279_s26 = sshll.u32 %s2575_s25, 7  ;;  %s2518_s25 = smov [#allocation2]  }
 0x26f   : > { %s3434_s9 = scalar_lea.hbm %s3482_s6, %s2279_s26  ;;  %p2448_p13 = pneg %p2447_p12 }
 0x270   : > { %v1586_v7 = vpop.permute.xlu0 %1585  ;;  %2058 = vperm.xlu1 %2393, %v2055_v5   ;;  %s2449_s14 = sshll.u32 %s2518_s25, 4  ;;  %s2450_s14 = int_to_ptr.vmem [resolvable:$false] %s2449_s14 }
 0x271   : > { %s2451_s15 = scalar_lea.vmem %s2450_s14, 256  ;;  %p2452_p0 = scmp.lt.s32.totalorder %s3436_s29, %s2450_s14 }
 0x272   : > { %v1720_v8 = vpop.permute.xlu1 %1719  ;;  %p2453_p1 = scmp.lt.s32.totalorder %s2451_s15, %s2445_s13 }
 0x274   : > { %v1722_v10 = vpop.permute.xlu0 %1721  ;;  %p2454_p2 = por %p2453_p1, %p2452_p0 }
 0x276   : > { %v1381_v0 = vpop.permute.xlu1 %1380  ;;  %p2455_p3 = pnand %p2454_p2, %p2448_p13 }
 0x277   : > { %v1388_v13 = vsel %vm322_vm4, %v1373_v60, %v1381_v0  ;;  %v1392_v15 = vsel %vm322_vm4, %v1381_v0, %v1373_v60 }
 0x278   : > { %v1383_v20 = vpop.permute.xlu0 %1382  ;;  %v1396_v24 = vmul.f32 %v1392_v15, %v2717_v43  ;;  %v1397_v25 = vmul.f32 %v1388_v13, %v2720_v44 }
 0x279   : > { %v1389_v21 = vsel %vm322_vm4, %v1375_v57, %v1383_v20  ;;  %v1393_v22 = vsel %vm322_vm4, %v1383_v20, %v1375_v57 }
 0x27a   : > { %v1398_v26 = vmul.f32 %v1393_v22, %v2717_v43  ;;  %v1399_v27 = vmul.f32 %v1389_v21, %v2720_v44  ;;  %v3092_v29 = vpop.permute.xlu1 %1343 }
 0x27c   : > { %v1406_v30 = vpack.c.bf16 %v1398_v26, %v1396_v24  ;;  %v1346_v32 = vpop.permute.xlu0 %1345  ;;  %v1407_v34 = vpack.c.bf16 %v1399_v27, %v1397_v25 }
 0x27e   : > { %v3094_v35 = vpop.permute.xlu1 %1507  ;;  %1414 = vmatprep.subr.bf16.mxu1 %v1407_v34 }
 0x27f   : > { %v1519_v36 = vsel %vm501_vm0, %v3094_v35, %v3067_v3  ;;  %1415 = vmatpush1.bf16.msra.mxu1 %v1406_v30 }
 0x280   : > { %v1510_v38 = vpop.permute.xlu0 %1509  ;;  %v3104_v40 = vmul.f32 %v1519_v36, %v2671_v16 }
 0x281   : > { %v1520_v39 = vsel %vm501_vm0, %v1510_v38, %v3071_v4 }
 0x282   : > { %v3107_v45 = vmul.f32 %v1520_v39, %v2671_v16  ;;  %v1592_v41 = vpop.permute.xlu1 %1591 }
 0x283   : > { %v1599_v42 = vsel %vm611_vm1, %v1584_v6, %v1592_v41  ;;  %v1603_v48 = vsel %vm611_vm1, %v1592_v41, %v1584_v6 }
 0x284   : > { %v1594_v52 = vpop.permute.xlu0 %1593  ;;  %v3120_v60 = vmul.f32 %v1603_v48, %v2674_v17  ;;  %v3123_v57 = vmul.f32 %v1599_v42, %v2677_v18 }
 0x285   : > { %v1600_v53 = vsel %vm611_vm1, %v1586_v7, %v1594_v52  ;;  %v1604_v55 = vsel %vm611_vm1, %v1594_v52, %v1586_v7 }
 0x286   : > { %v3126_v5 = vmul.f32 %v1604_v55, %v2674_v17  ;;  %v3129_v6 = vmul.f32 %v1600_v53, %v2677_v18  ;;  %v1728_v0 = vpop.permute.xlu1 %1727 }
 0x287   : > { %v1735_v13 = vsel %vm811_vm5, %v1720_v8, %v1728_v0  ;;  %v1739_v15 = vsel %vm811_vm5, %v1728_v0, %v1720_v8 }
 0x288   : > { %v1730_v20 = vpop.permute.xlu0 %1729  ;;  %v3144_v25 = vmul.f32 %v1735_v13, %v2788_v23  ;;  %v3147_v26 = vmul.f32 %v1739_v15, %v2741_v54  ;;  %v1352_v13 = vsel %vm296_vm6, %v3063_v2, %v1346_v32 }
 0x289   : > { %v1736_v22 = vsel %vm811_vm5, %v1722_v10, %v1730_v20  ;;  %v1740_v24 = vsel %vm811_vm5, %v1730_v20, %v1722_v10  ;;  %v1356_v10 = vsel %vm296_vm6, %v1346_v32, %v3063_v2  ;;  %v1362_v7 = vmul.f32 %v1352_v13, %v2762_v63 }
 0x28a   : > { %v3150_v8 = vmul.f32 %v1736_v22, %v2788_v23  ;;  %v3153_v27 = vmul.f32 %v1740_v24, %v2741_v54  ;;  %v1377_v30 = vpop.permute.xlu1 %1376  ;;  %v1351_v24 = vsel %vm296_vm6, %v3059_v58, %v3092_v29  ;;  %v1355_v2 = vsel %vm296_vm6, %v3092_v29, %v3059_v58 }
 0x28b   : > { %v1360_v32 = vmul.f32 %v1351_v24, %v2762_v63 }
 0x28c   : > { %v1379_v36 = vpop.permute.xlu0 %1378 }
 0x28e   : > { %v1340_v39 = vpop.permute.xlu1 %1339 }
 0x290   : > { %v1342_v41 = vpop.permute.xlu0 %1341 }
 0x292   : > { %v1504_v42 = vpop.permute.xlu1 %1503 }
 0x294   : > { %v3159_v48 = vpop.permute.xlu0 %1505 }
 0x296   : > { %v3161_v52 = vpop.permute.xlu1 %1587 }
 0x298   : > { %v3163_v53 = vpop.permute.xlu0 %1589 }
 0x29a   : > { %v3165_v55 = vpop.permute.xlu1 %1723 }
 0x29c   : > { %v3167_v0 = vpop.permute.xlu0 %1725 }
 0x29e   : > { %v1385_v15 = vpop.permute.xlu1 %1384 }
 0x29f   : > { %v1390_v20 = vsel %vm322_vm4, %v1377_v30, %v1385_v15  ;;  %v1394_v22 = vsel %vm322_vm4, %v1385_v15, %v1377_v30 }
 0x2a0   : > { %v1387_v34 = vpop.permute.xlu0 %1386  ;;  %v1400_v30 = vmul.f32 %v1394_v22, %v2717_v43  ;;  %v1401_v15 = vmul.f32 %v1390_v20, %v2720_v44 }
 0x2a1   : > { %v1391_v21 = vsel %vm322_vm4, %v1379_v36, %v1387_v34  ;;  %v1395_v50 = vsel %vm322_vm4, %v1387_v34, %v1379_v36  ;;  %v1361_v36 = vmul.f32 %v1356_v10, %v2759_v62 }
 0x2a2   : > { %v1402_v1 = vmul.f32 %v1395_v50, %v2717_v43  ;;  %v1403_v11 = vmul.f32 %v1391_v21, %v2720_v44  ;;  %v3192_v61 = vpop.permute.xlu1 %1803  ;;  %v1516_v43 = vsel %vm501_vm0, %v3071_v4, %v1510_v38  ;;  %v1369_v50 = vpack.c.bf16 %v1362_v7, %v1360_v32 }
 0x2a3   : > { %v1359_v21 = vmul.f32 %v1355_v2, %v2759_v62  ;;  %v1515_v4 = vsel %vm501_vm0, %v3067_v3, %v3094_v35  ;;  %v1526_v7 = vmul.f32 %v1516_v43, %v2680_v19  ;;  %v3496_v35 = vmov 0  }
 0x2a4   : > { %v1408_v13 = vpack.c.bf16 %v1402_v1, %v1400_v30  ;;  %v3199_v51 = vpop.permute.xlu0 %1805  ;;  %v1409_v34 = vpack.c.bf16 %v1403_v11, %v1401_v15  ;;  %v2255_v11 = vld [vmem:[%s3480_s4 + $0x2] sm:$0x3]  ;;  %v1524_v15 = vmul.f32 %v1515_v4, %v2680_v19  ;;  %v3497_v4 = vpack.c.bf16 %v3107_v45, %v3104_v40  ;;  %v2258_v40 = vld [vmem:[%s3480_s4 + $0x4] sm:$0x3] }
 0x2a5   : > { %v1368_v38 = vpack.c.bf16 %v1361_v36, %v1359_v21  ;;  %v1367_v36 = vld [vmem:[%s3480_s4] sm:$0x3]  ;;  %v3498_v45 = vpack.c.bf16 %v3129_v6, %v3123_v57  ;;  %v3499_v57 = vpack.c.bf16 %v3126_v5, %v3120_v60  ;;  %v1669_v60 = vpack.c.bf16 %v2927_v14, %v2925_v12 }
 0x2a6   : > { %v1348_v44 = vpop.permute.xlu1 %1347  ;;  %1416 = vmatprep.subr.bf16.mxu1 %v1409_v34  ;;  %v1534_v34 = vpack.c.bf16 %v1526_v7, %v1524_v15 }
 0x2a7   : > { %v1353_v58 = vsel %vm296_vm6, %v1340_v39, %v1348_v44  ;;  %v1357_v1 = vsel %vm296_vm6, %v1348_v44, %v1340_v39  ;;  %1417 = vmatpush1.bf16.msra.mxu1 %v1408_v13 }
 0x2a8   : > { %1458 = vmatprep.subr.bf16.mxu1 %v1369_v50  ;;  %v1350_v29 = vpop.permute.xlu0 %1349  ;;  %v1363_v20 = vmul.f32 %v1357_v1, %v2759_v62  ;;  %v1364_v22 = vmul.f32 %v1353_v58, %v2762_v63 }
 0x2a9   : > { %v1354_v10 = vsel %vm296_vm6, %v1342_v41, %v1350_v29  ;;  %v1358_v39 = vsel %vm296_vm6, %v1350_v29, %v1342_v41 }
 0x2aa   : > { %v1365_v24 = vmul.f32 %v1358_v39, %v2759_v62  ;;  %v1366_v30 = vmul.f32 %v1354_v10, %v2762_v63  ;;  %v1512_v3 = vpop.permute.xlu1 %1511  ;;  %2256 = vmatmul.mubr.msk.bf16.vlgmr.msra.gmra.mrb[8].mxu1 %vm1410_vm10, %v2255_v11 }
 0x2ab   : > { %1459 = vmatpush1.bf16.msra.mxu1 %v1368_v38  ;;  %1490 = vmatprep.mubr.bf16.mxu1 %v3496_v35  ;;  %v1517_v62 = vsel %vm501_vm0, %v1504_v42, %v1512_v3  ;;  %v1521_v63 = vsel %vm501_vm0, %v1512_v3, %v1504_v42 }
 0x2ac   : > { %v1370_v2 = vpack.c.bf16 %v1365_v24, %v1363_v20  ;;  %v3229_v32 = vpop.permute.xlu0 %1813  ;;  %v1371_v41 = vpack.c.bf16 %v1366_v30, %v1364_v22  ;;  %v1527_v21 = vmul.f32 %v1521_v63, %v2671_v16  ;;  %v1528_v58 = vmul.f32 %v1517_v62, %v2680_v19 }
 0x2ad   : > { %v3500_v62 = vpack.c.bf16 %v3153_v27, %v3147_v26 }
 0x2ae   : > { %v1596_v13 = vpop.permute.xlu1 %1595  ;;  %1460 = vmatprep.subr.bf16.mxu1 %v1371_v41 }
 0x2af   : > { %1461 = vmatpush1.bf16.msra.mxu1 %v1370_v2 }
 0x2b0   : > { %1540 = vmatprep.subr.bf16.mxu1 %v1534_v34  ;;  %v1514_v43 = vpop.permute.xlu0 %1513 }
 0x2b1   : > { %v1518_v44 = vsel %vm501_vm0, %v3159_v48, %v1514_v43  ;;  %v1522_v50 = vsel %vm501_vm0, %v1514_v43, %v3159_v48 }
 0x2b2   : > { %v1529_v42 = vmul.f32 %v1522_v50, %v2671_v16  ;;  %v1530_v1 = vmul.f32 %v1518_v44, %v2680_v19  ;;  %v1732_v11 = vpop.permute.xlu1 %1731  ;;  %2257 = vmatmul.mubr.msk.bf16.vlgmr.msra.gmra.mrb[12].mxu1 %vm1410_vm10, %v1367_v36  ;;  %v1601_v16 = vsel %vm611_vm1, %v3161_v52, %v1596_v13  ;;  %v1605_v19 = vsel %vm611_vm1, %v1596_v13, %v3161_v52 }
 0x2b3   : > { %1541 = vmatpush1.bf16.msra.mxu1 %v3497_v4  ;;  %1572 = vmatprep.mubr.bf16.mxu1 %v3496_v35  ;;  %v1611_v52 = vmul.f32 %v1605_v19, %v2674_v17  ;;  %v1612_v22 = vmul.f32 %v1601_v16, %v2677_v18  ;;  %v1672_v13 = vpack.c.bf16 %v2999_v59, %v2995_v56  ;;  %v2262_v59 = vld [vmem:[%s3480_s4 + $0x8] sm:$0x3] }
 0x2b4   : > { %v1535_v29 = vpack.c.bf16 %v1529_v42, %v1527_v21  ;;  %v3253_v38 = vpop.permute.xlu0 %1809  ;;  %v1536_v48 = vpack.c.bf16 %v1530_v1, %v1528_v58  ;;  %v1737_v34 = vsel %vm811_vm5, %v3165_v55, %v1732_v11  ;;  %v1741_v14 = vsel %vm811_vm5, %v1732_v11, %v3165_v55 }
 0x2b5   : > { %v1747_v55 = vmul.f32 %v1737_v34, %v2788_v23  ;;  %v1748_v44 = vmul.f32 %v1741_v14, %v2741_v54  ;;  %v3501_v58 = vpack.c.bf16 %v3150_v8, %v3144_v25 }
 0x2b6   : > { %v1812_v7 = vpop.permute.xlu1 %1811  ;;  %1542 = vmatprep.subr.bf16.mxu1 %v1536_v48 }
 0x2b7   : > { %1543 = vmatpush1.bf16.msra.mxu1 %v1535_v29  ;;  %v1823_v56 = vsel %vm921_vm7, %v1812_v7, %v3192_v61  ;;  %v1819_v63 = vsel %vm921_vm7, %v3192_v61, %v1812_v7  ;;  %v1820_v61 = vsel %vm921_vm7, %v3199_v51, %v3229_v32 }
 0x2b8   : > { %1624 = vmatprep.subr.bf16.mxu1 %v3498_v45  ;;  %v1598_v10 = vpop.permute.xlu0 %1597  ;;  %v1828_v50 = vmul.f32 %v1823_v56, %v2806_v28  ;;  %v1829_v4 = vmul.f32 %v1820_v61, %v2830_v37 }
 0x2b9   : > { %v1602_v39 = vsel %vm611_vm1, %v3163_v53, %v1598_v10  ;;  %v1606_v20 = vsel %vm611_vm1, %v1598_v10, %v3163_v53 }
 0x2ba   : > { %v1613_v24 = vmul.f32 %v1606_v20, %v2674_v17  ;;  %v1614_v30 = vmul.f32 %v1602_v39, %v2677_v18  ;;  %v1808_v3 = vpop.permute.xlu1 %1807  ;;  %2259 = vmatmul.mubr.msk.bf16.vlgmr.msra.gmra.mrb[16].mxu1 %vm1410_vm10, %v2258_v40  ;;  %v1670_v17 = vpack.c.bf16 %v2951_v33, %v2947_v31  ;;  %v2260_v18 = vld [vmem:[%s3480_s4 + $0x6] sm:$0x3]  ;;  %v1671_v33 = vpack.c.bf16 %v2975_v49, %v2971_v47 }
 0x2bb   : > { %1625 = vmatpush1.bf16.msra.mxu1 %v3499_v57  ;;  %1656 = vmatprep.mubr.bf16.mxu1 %v3496_v35  ;;  %v1824_v47 = vsel %vm921_vm7, %v3229_v32, %v3199_v51  ;;  %v2264_v32 = vld [vmem:[%s3480_s4 + $0xa] sm:$0x3] }
 0x2bc   : > { %v1619_v6 = vpack.c.bf16 %v1613_v24, %v1611_v52  ;;  %v3282_v15 = vpop.permute.xlu0 %1889  ;;  %v1620_v53 = vpack.c.bf16 %v1614_v30, %v1612_v22 }
 0x2be   : > { %v1816_v2 = vpop.permute.xlu1 %1815  ;;  %1626 = vmatprep.subr.bf16.mxu1 %v1620_v53 }
 0x2bf   : > { %1627 = vmatpush1.bf16.msra.mxu1 %v1619_v6  ;;  %v1821_v11 = vsel %vm921_vm7, %v1808_v3, %v1816_v2  ;;  %v1825_v25 = vsel %vm921_vm7, %v1816_v2, %v1808_v3  ;;  %v3502_v3 = vld [vmem:[#allocation5_spill] sm:$0xff] }
 0x2c0   : > { %1676 = vmatprep.subr.bf16.mxu1 %v1670_v17  ;;  %v1898_v41 = vpop.permute.xlu0 %1897  ;;  %v1831_v7 = vmul.f32 %v1821_v11, %v2830_v37  ;;  %v1832_v39 = vmul.f32 %v1825_v25, %v2806_v28 }
 0x2c1   : > { %v1908_v19 = vsel %vm1031_vm8, %v1898_v41, %v3282_v15  ;;  %v1904_v30 = vsel %vm1031_vm8, %v3282_v15, %v1898_v41 }
 0x2c2   : > { %v1888_v5 = vpop.permute.xlu1 %1887  ;;  %2261 = vmatmul.mubr.msk.bf16.vlgmr.msra.gmra.mrb[20].mxu1 %vm1410_vm10, %v2260_v18 }
 0x2c3   : > { %1677 = vmatpush1.bf16.msra.mxu1 %v1669_v60  ;;  %1708 = vmatprep.mubr.bf16.mxu1 %v3496_v35  ;;  %v2266_v60 = vld [vmem:[%s3480_s4 + $0xc] sm:$0x3] }
 0x2c4   : > { %v3295_v31 = vpop.permute.xlu0 %1893  ;;  %1678 = vmatprep.subr.bf16.mxu1 %v1672_v13 }
 0x2c6   : > { %v1896_v12 = vpop.permute.xlu1 %1895 }
 0x2c7   : > { %1679 = vmatpush1.bf16.msra.mxu1 %v1671_v33  ;;  %v1907_v8 = vsel %vm1031_vm8, %v1896_v12, %v1888_v5  ;;  %v1903_v40 = vsel %vm1031_vm8, %v1888_v5, %v1896_v12 }
 0x2c8   : > { %v1734_v49 = vpop.permute.xlu0 %1733  ;;  %1760 = vmatprep.subr.bf16.mxu1 %v3500_v62  ;;  %v1912_v20 = vmul.f32 %v1907_v8, %v2848_v46  ;;  %v1911_v57 = vmul.f32 %v1903_v40, %v3502_v3 }
 0x2c9   : > { %v1738_v36 = vsel %vm811_vm5, %v3167_v0, %v1734_v49  ;;  %v1742_v43 = vsel %vm811_vm5, %v1734_v49, %v3167_v0  ;;  %v1830_v0 = vmul.f32 %v1824_v47, %v2806_v28  ;;  %v3503_v47 = vld [vmem:[#allocation6_spill] sm:$0xff] }
 0x2ca   : > { %v1749_v26 = vmul.f32 %v1738_v36, %v2788_v23  ;;  %v1750_v27 = vmul.f32 %v1742_v43, %v2741_v54  ;;  %v1892_v21 = vpop.permute.xlu1 %1891  ;;  %2263 = vmatmul.mubr.msk.bf16.vlgmr.msra.gmra.mrb[24].mxu1 %vm1410_vm10, %v2262_v59  ;;  %v1827_v23 = vmul.f32 %v1819_v63, %v2830_v37 }
 0x2cb   : > { %1761 = vmatpush1.bf16.msra.mxu1 %v3501_v58  ;;  %1792 = vmatprep.mubr.bf16.mxu1 %v3496_v35  ;;  %v1838_v51 = vpack.c.bf16 %v1830_v0, %v1828_v50 }
 0x2cc   : > { %v1755_v42 = vpack.c.bf16 %v1749_v26, %v1747_v55  ;;  %v1974_v54 = vpop.permute.xlu0 %1973  ;;  %v1756_v1 = vpack.c.bf16 %v1750_v27, %v1748_v44  ;;  %v1837_v48 = vpack.c.bf16 %v1829_v4, %v1827_v23  ;;  %v3504_v26 = vld [vmem:[#allocation7_spill] sm:$0xff]  ;;  %v2268_v23 = vld [vmem:[%s3480_s4 + $0xe] sm:$0x3] }
 0x2ce   : > { %v1900_v29 = vpop.permute.xlu1 %1899  ;;  %1762 = vmatprep.subr.bf16.mxu1 %v1756_v1 }
 0x2cf   : > { %1763 = vmatpush1.bf16.msra.mxu1 %v1755_v42  ;;  %v1909_v17 = vsel %vm1031_vm8, %v1900_v29, %v1892_v21 }
 0x2d0   : > { %v1818_v16 = vpop.permute.xlu0 %1817  ;;  %1844 = vmatprep.subr.bf16.mxu1 %v1838_v51  ;;  %v1916_v34 = vmul.f32 %v1909_v17, %v2848_v46 }
 0x2d1   : > { %v1822_v45 = vsel %vm921_vm7, %v3253_v38, %v1818_v16  ;;  %v1826_v10 = vsel %vm921_vm7, %v1818_v16, %v3253_v38  ;;  %v1914_v38 = vmul.f32 %v1908_v19, %v2848_v46 }
 0x2d2   : > { %v1833_v52 = vmul.f32 %v1822_v45, %v2830_v37  ;;  %v1834_v22 = vmul.f32 %v1826_v10, %v2806_v28  ;;  %v1972_v24 = vpop.permute.xlu1 %1971  ;;  %2265 = vmatmul.mubr.msk.bf16.vlgmr.msra.gmra.mrb[28].mxu1 %vm1410_vm10, %v2264_v32  ;;  %v1905_v28 = vsel %vm1031_vm8, %v1892_v21, %v1900_v29  ;;  %v1913_v37 = vmul.f32 %v1904_v30, %v3502_v3 }
 0x2d3   : > { %1845 = vmatpush1.bf16.msra.mxu1 %v1837_v48  ;;  %1876 = vmatprep.mubr.bf16.mxu1 %v3496_v35  ;;  %v1922_v15 = vpack.c.bf16 %v1914_v38, %v1912_v20  ;;  %v1915_v13 = vmul.f32 %v1905_v28, %v3502_v3 }
 0x2d4   : > { %v1839_v6 = vpack.c.bf16 %v1833_v52, %v1831_v7  ;;  %v1982_v53 = vpop.permute.xlu0 %1981  ;;  %v1840_v2 = vpack.c.bf16 %v1834_v22, %v1832_v39  ;;  %v1921_v5 = vpack.c.bf16 %v1913_v37, %v1911_v57 }
 0x2d5   : > { %v1992_v12 = vsel %vm1141_vm9, %v1982_v53, %v1974_v54  ;;  %v1988_v36 = vsel %vm1141_vm9, %v1974_v54, %v1982_v53 }
 0x2d6   : > { %v1980_v18 = vpop.permute.xlu1 %1979  ;;  %1846 = vmatprep.subr.bf16.mxu1 %v1840_v2 }
 0x2d7   : > { %v1991_v41 = vsel %vm1141_vm9, %v1980_v18, %v1972_v24  ;;  %1847 = vmatpush1.bf16.msra.mxu1 %v1839_v6  ;;  %v1987_v59 = vsel %vm1141_vm9, %v1972_v24, %v1980_v18 }
 0x2d8   : > { %v1902_v33 = vpop.permute.xlu0 %1901  ;;  %1928 = vmatprep.subr.bf16.mxu1 %v1922_v15  ;;  %v1996_v49 = vmul.f32 %v1991_v41, %v3503_v47  ;;  %v1995_v27 = vmul.f32 %v1987_v59, %v3504_v26 }
 0x2d9   : > { %v1906_v14 = vsel %vm1031_vm8, %v3295_v31, %v1902_v33  ;;  %v1910_v56 = vsel %vm1031_vm8, %v1902_v33, %v3295_v31  ;;  %v1998_v31 = vmul.f32 %v1992_v12, %v3503_v47 }
 0x2da   : > { %v1917_v62 = vmul.f32 %v1906_v14, %v3502_v3  ;;  %v1918_v55 = vmul.f32 %v1910_v56, %v2848_v46  ;;  %v1976_v63 = vpop.permute.xlu1 %1975  ;;  %2267 = vmatmul.mubr.msk.bf16.vlgmr.msra.gmra.mrb[32].mxu1 %vm1410_vm10, %v2266_v60  ;;  %v1997_v46 = vmul.f32 %v1988_v36, %v3504_v26 }
 0x2db   : > { %1929 = vmatpush1.bf16.msra.mxu1 %v1921_v5  ;;  %1960 = vmatprep.mubr.bf16.mxu1 %v3496_v35  ;;  %v2006_v61 = vpack.c.bf16 %v1998_v31, %v1996_v49 }
 0x2dc   : > { %v1923_v43 = vpack.c.bf16 %v1917_v62, %v1915_v13  ;;  %v1978_v44 = vpop.permute.xlu0 %1977  ;;  %v1924_v50 = vpack.c.bf16 %v1918_v55, %v1916_v34  ;;  %v2005_v54 = vpack.c.bf16 %v1997_v46, %v1995_v27 }
 0x2de   : > { %v1984_v21 = vpop.permute.xlu1 %1983  ;;  %1930 = vmatprep.subr.bf16.mxu1 %v1924_v50 }
 0x2df   : > { %v1989_v58 = vsel %vm1141_vm9, %v1976_v63, %v1984_v21  ;;  %v1993_v0 = vsel %vm1141_vm9, %v1984_v21, %v1976_v63  ;;  %1931 = vmatpush1.bf16.msra.mxu1 %v1923_v43 }
 0x2e0   : > { %v1986_v42 = vpop.permute.xlu0 %1985  ;;  %2012 = vmatprep.subr.bf16.mxu1 %v2006_v61  ;;  %v1999_v4 = vmul.f32 %v1989_v58, %v3504_v26  ;;  %v2000_v29 = vmul.f32 %v1993_v0, %v3503_v47 }
 0x2e1   : > { %v1990_v1 = vsel %vm1141_vm9, %v1978_v44, %v1986_v42  ;;  %v1994_v11 = vsel %vm1141_vm9, %v1986_v42, %v1978_v44 }
 0x2e2   : > { %v2001_v51 = vmul.f32 %v1990_v1, %v3504_v26  ;;  %v2002_v25 = vmul.f32 %v1994_v11, %v3503_v47  ;;  %2269 = vmatmul.mubr.msk.bf16.vlgmr.msra.gmra.mrb[36].mxu1 %vm1410_vm10, %v2268_v23 }
 0x2e3   : > { %2013 = vmatpush1.bf16.msra.mxu1 %v2005_v54  ;;  %2044 = vmatprep.mubr.bf16.mxu1 %v3496_v35 }
 0x2e4   : > { %v2007_v8 = vpack.c.bf16 %v2001_v51, %v1999_v4  ;;  %v2008_v32 = vpack.c.bf16 %v2002_v25, %v2000_v29 }
 0x2e6   : > { %2014 = vmatprep.subr.bf16.mxu1 %v2008_v32 }
 0x2e7   : > { %2015 = vmatpush1.bf16.msra.mxu1 %v2007_v8 }
 0x2ea   : > { %2271 = vmatmul.mubr.msk.bf16.vlgmr.msra.gmra.mrb[40].mxu1 %vm1410_vm10, %v2270_v9 }
 0x2ef   : > { %v2059_v46 = vpop.permute.xlu1 %2058 }
 0x37d   : > { %v1448_v48 = vpop.f32.mrb[8].mxu1 }
 0x37e   : > { %v1450_v7 = vpop.f32.mrb[9].mxu1 }
 0x37f   : > { %v1452_v16 = vpop.f32.mrb[10].mxu1 }
 0x380   : > { %v1453_v19 = vpop.f32.mrb[11].mxu1 }
 0x385   : > { %v1492_v40 = vpop.f32.mrb[12].mxu1 }
 0x386   : > { %v1493_v45 = vadd.f32 %v1492_v40, %v1448_v48  ;;  %v1494_v10 = vpop.f32.mrb[13].mxu1 }
 0x387   : > { %v1495_v39 = vadd.f32 %v1494_v10, %v1450_v7  ;;  %v1496_v20 = vpop.f32.mrb[14].mxu1 }
 0x388   : > { %v1497_v35 = vpop.f32.mrb[15].mxu1 }
 0x38d   : > { %v1574_v52 = vpop.f32.mrb[16].mxu1 }
 0x38e   : > { %v1581_v22 = vadd.f32 %v1574_v52, %v1493_v45  ;;  %v1576_v24 = vpop.f32.mrb[17].mxu1 }
 0x38f   : > { %v1582_v30 = vadd.f32 %v1576_v24, %v1495_v39  ;;  %v1578_v38 = vpop.f32.mrb[18].mxu1 }
 0x390   : > { %v1579_v3 = vpop.f32.mrb[19].mxu1 }
 0x395   : > { %v1658_v57 = vpop.f32.mrb[20].mxu1 }
 0x396   : > { %v1665_v6 = vadd.f32 %v1658_v57, %v1581_v22  ;;  %v1660_v53 = vpop.f32.mrb[21].mxu1 }
 0x397   : > { %v1666_v2 = vadd.f32 %v1660_v53, %v1582_v30  ;;  %v1662_v28 = vpop.f32.mrb[22].mxu1 }
 0x398   : > { %v1663_v37 = vpop.f32.mrb[23].mxu1 }
 0x39d   : > { %v1710_v17 = vpop.f32.mrb[24].mxu1 }
 0x39e   : > { %v1717_v18 = vadd.f32 %v1710_v17, %v1665_v6  ;;  %v1712_v15 = vpop.f32.mrb[25].mxu1 }
 0x39f   : > { %v1718_v41 = vadd.f32 %v1712_v15, %v1666_v2  ;;  %v1714_v60 = vpop.f32.mrb[26].mxu1 }
 0x3a0   : > { %v1715_v5 = vpop.f32.mrb[27].mxu1 }
 0x3a5   : > { %v1794_v13 = vpop.f32.mrb[28].mxu1 }
 0x3a6   : > { %v1801_v33 = vadd.f32 %v1794_v13, %v1717_v18  ;;  %v1796_v34 = vpop.f32.mrb[29].mxu1 }
 0x3a7   : > { %v1802_v12 = vadd.f32 %v1796_v34, %v1718_v41  ;;  %v1798_v14 = vpop.f32.mrb[30].mxu1 }
 0x3a8   : > { %v1799_v56 = vpop.f32.mrb[31].mxu1 }
 0x3ad   : > { %v1878_v59 = vpop.f32.mrb[32].mxu1 }
 0x3ae   : > { %v1885_v47 = vadd.f32 %v1878_v59, %v1801_v33  ;;  %v1880_v49 = vpop.f32.mrb[33].mxu1 }
 0x3af   : > { %v1886_v62 = vadd.f32 %v1880_v49, %v1802_v12  ;;  %v1882_v55 = vpop.f32.mrb[34].mxu1 }
 0x3b0   : > { %v1883_v63 = vpop.f32.mrb[35].mxu1 }
 0x3b5   : > { %v1962_v36 = vpop.f32.mrb[36].mxu1 }
 0x3b6   : > { %v1969_v31 = vadd.f32 %v1962_v36, %v1885_v47  ;;  %v1964_v43 = vpop.f32.mrb[37].mxu1 }
 0x3b7   : > { %v1970_v44 = vadd.f32 %v1964_v43, %v1886_v62  ;;  %v1966_v50 = vpop.f32.mrb[38].mxu1 }
 0x3b8   : > { %v1967_v26 = vpop.f32.mrb[39].mxu1 }
 0x3bd   : > { %v2046_v27 = vpop.f32.mrb[40].mxu1 }
 0x3be   : > { %v2053_v21 = vadd.f32 %v2046_v27, %v1969_v31  ;;  %v2048_v61 = vpop.f32.mrb[41].mxu1 }
 0x3bf   : > { %v2054_v58 = vadd.f32 %v2048_v61, %v1970_v44  ;;  %v2050_v0 = vpop.f32.mrb[42].mxu1 }
 0x3c0   : > { %v2061_v23 = vadd.f32 %v2059_v46, %v2053_v21  ;;  %v2051_v42 = vpop.f32.mrb[43].mxu1 }
 0x3c1   : > { %v2062_v54 = vadd.f32 %v2059_v46, %v2054_v58 }
 0x3c3   : > { %v2065_v1 = vcombine.low %v2061_v23, %v2062_v54 }
 0x3c5   : > { %2067 = vst [vmem:[%s259_s28] sm:$0xff] %v2065_v1 }
 0x3c6   : > { %2458 = shalt.err (!%p2455_p3)
}
 0x3c7   : > { %s2459_s16 = scalar_lea.hbm %s3434_s9, 128  ;;  %s2463_s19 = scalar_lea.hbm %s3482_s6, 256 }
 0x3c8   : > { %p2460_p4 = scmp.ne.s32.totalorder %s3434_s9, %s2459_s16  ;;  %p2464_p9 = scmp.lt.u32.totalorder %s3434_s9, %s3482_s6 }
 0x3c9   : > { %p2465_p10 = scmp.lt.u32.totalorder %s2463_s19, %s2459_s16  ;;  %p2467_p12 = scmp.lt.u32.totalorder %s2459_s16, %s3434_s9 }
 0x3ca   : > { %p2461_p7 = pnand %p2460_p4, %p2592_p5 }
 0x3cb   : > { %p2466_p11 = por %p2465_p10, %p2464_p9 }
 0x3cc   : > { %p2462_p8 = pneg %p2461_p7 }
 0x3cd   : > { %p2468_p13 = por %p2467_p12, %p2466_p11 }
 0x3cf   : > { %p2469_p0 = pnand %p2468_p13, %p2462_p8 }
 0x3d1   : > { %2472 = shalt.err (!%p2469_p0)
}
 0x3d2   : > { %2344 = dma.vmem_to_hbm [thread:$0]  (%p2592_p5), %s3436_s29, 128, %s3434_s9, %s2069_s12  }
 0x3d3 PF: > { %p2350_p1 = scmp.ge.s32.totalorder %s2507_s24, 2  ;;  %s2095_s28 = sand.u32 1, %s2495_s21  }
 0x3d4   : > { %s2096_s10 = scalar_lea.sflag [#allocation3], %s2095_s28 }
 0x3d5   : > { %p2347_p2 = pnand %p2350_p1, %p2596_p6 }
 0x3d7   : > { %2490 = dma.done.wait (!%p2347_p2), %s2096_s10, 128  }
 0x3d8   : > { %2492 = vsyncadd (!%p2347_p2), %s2096_s10, 4294967168  ;;  %p16_p3 = scmp.ge.s32.totalorder %s2579_s27, 4   ;;  %s3505_s21 = smov %s2499_s22 }
 0x3d9   : > { %s3506_s22 = smov %s2503_s23  ;;  %s3507_s23 = smov %s2590_s30 }
 0x3da   : > { %s3508_s24 = smov %s2579_s27  ;;  %18 = sbr.rel (!%p16_p3) target bundleno = 3 (0x3), region = 105 }
 0x3e1   :  { %2101 = vsyncpa [#allocation3], 1 }
 0x3e2   :  { %2103 = vsyncpa [#allocation3 + $0x1], 1 }

</bundles_post_ra>
